<compile_context>
chip_gen: v7x
topology: tpu7x:2x2x1
jax: 0.10.0
libtpu: 0.0.40
codegen_flags: <defaults>
</compile_context>

<pallas_src>
import functools
import math

import jax
import jax.numpy as jnp
from jax.experimental import pallas as pl
from jax.experimental.pallas import tpu as pltpu


# ----------------------------------------------------------------------------
# Fused kernel: all LSTM layers + final Linear in one invocation (no grid).
# ----------------------------------------------------------------------------
def fused_lstm_fc_kernel(*refs, num_layers, seq_len, batch, hidden_dim):
    """Ref layout (positional):
      refs[0]                 x2d_ref  (T*B, Din)  time-major, rows [t*B:(t+1)*B] = step t
      refs[1+3l : 4+3l]       (wih_ref (Din_l, 4H), whh_ref (H, 4H), b_ref (1, 4H)) per layer
                              NOTE: g-gate columns [2H:3H) are pre-scaled by 2.
      refs[1+3L], refs[2+3L]  fc_w_ref (H, O), fc_b_ref (1, O)
      refs[3+3L]              out_ref (B, O)
    """
    T, B, H = seq_len, batch, hidden_dim
    x2d_ref = refs[0]
    fc_w_ref = refs[1 + 3 * num_layers]
    fc_b_ref = refs[2 + 3 * num_layers]
    out_ref = refs[3 + 3 * num_layers]

    layer_in = x2d_ref[...].astype(jnp.float32)           # (T*B, Din)

    for layer in range(num_layers):
        wih_ref, whh_ref, b_ref = refs[1 + 3 * layer:4 + 3 * layer]
        last_layer = layer == num_layers - 1

        # Hoisted input projection (+ combined bias) for ALL timesteps at once.
        gx = (
            jnp.dot(layer_in, wih_ref[...], preferred_element_type=jnp.float32)
            + b_ref[...]
        )                                                  # (T*B, 4H)
        whh = whh_ref[...]                                 # (H, 4H), VMEM-resident

        h = jnp.zeros((B, H), jnp.float32)
        c = jnp.zeros((B, H), jnp.float32)
        hs = []                                            # per-step h, kept in vregs

        # Static, fully-unrolled recurrence (T is small & known at trace time).
        for t in range(T):
            gates = gx[t * B:(t + 1) * B, :] + jnp.dot(
                h, whh, preferred_element_type=jnp.float32)    # (B, 4H)

            # ONE full-width sigmoid over all four gates (EUP); the g-gate
            # pre-activations were scaled by 2 at init, so
            # tanh(x) = 2*sigmoid(2x) - 1 is a single VPU fma on the g slice.
            sig = jax.nn.sigmoid(gates)
            i_g = sig[:, 0 * H:1 * H]
            f_g = sig[:, 1 * H:2 * H]
            g_g = 2.0 * sig[:, 2 * H:3 * H] - 1.0
            o_g = sig[:, 3 * H:4 * H]

            c = f_g * c + i_g * g_g
            h = o_g * jnp.tanh(c)

            if not last_layer:
                hs.append(h)
        # For the last layer only the final h is needed (feeds the FC).

        if not last_layer:
            # Inter-layer handoff stays in registers (time-major (T*B, H)),
            # no VMEM scratch round-trip.
            layer_in = jnp.concatenate(hs, axis=0)

    # Fused final Linear on the last timestep's hidden state.
    out_ref[...] = (
        jnp.dot(h, fc_w_ref[...], preferred_element_type=jnp.float32)
        + fc_b_ref[...]
    ).astype(out_ref.dtype)


# ----------------------------------------------------------------------------
# Wrapper
# ----------------------------------------------------------------------------
def _scale_g_gate_cols(arr_2d, hidden_dim):
    """Scale the g-gate column block [2H:3H) by 2 (for the 2*sigmoid(2x)-1 trick)."""
    H = hidden_dim
    return arr_2d.at[:, 2 * H:3 * H].multiply(2.0)


def lstm_model_forward(x_btd, layer_params, fc_w_t, fc_b, hidden_dim):
    """Equivalent of the PyTorch module forward.

    x_btd: (B, T, input_dim) batch-first (PyTorch convention).
    layer_params: list of (wih_t, whh_t, bias) per layer (already transposed,
                  bias = b_ih + b_hh, shape (1, 4H)), UNSCALED.
    """
    B, T, Din = x_btd.shape
    O = fc_w_t.shape[1]
    num_layers = len(layer_params)

    # Time-major, then collapse (T, B) so the layer-0 input projection is one matmul.
    # TODO(synk): fold this transpose into the kernel once T*B*Din is large enough
    # for the extra HBM pass to matter.
    x2d = jnp.transpose(x_btd, (1, 0, 2)).reshape(T * B, Din)

    flat_weights = []
    for (wih_t, whh_t, bias) in layer_params:
        flat_weights += [
            _scale_g_gate_cols(wih_t, hidden_dim),
            _scale_g_gate_cols(whh_t, hidden_dim),
            _scale_g_gate_cols(bias, hidden_dim),
        ]

    kernel = functools.partial(
        fused_lstm_fc_kernel,
        num_layers=num_layers, seq_len=T, batch=B, hidden_dim=hidden_dim)

    n_inputs = 1 + 3 * num_layers + 2
    vmem_spec = pl.BlockSpec(memory_space=pltpu.MemorySpace.VMEM)

    return pl.pallas_call(
        kernel,
        out_shape=jax.ShapeDtypeStruct((B, O), jnp.float32),
        in_specs=[vmem_spec] * n_inputs,
        out_specs=vmem_spec,
    )(x2d, *flat_weights, fc_w_t, fc_b)


# ----------------------------------------------------------------------------
# Pure-JAX reference (for correctness check) — uses UNSCALED params.
# ----------------------------------------------------------------------------
def lstm_model_ref(x_btd, layer_params, fc_w_t, fc_b, hidden_dim):
    B, T, _ = x_btd.shape
    H = hidden_dim
    inp = x_btd
    for (wih_t, whh_t, bias) in layer_params:
        h = jnp.zeros((B, H), jnp.float32)
        c = jnp.zeros((B, H), jnp.float32)
        outs = []
        for t in range(T):
            gates = inp[:, t, :] @ wih_t + h @ whh_t + bias
            i_g = jax.nn.sigmoid(gates[:, 0 * H:1 * H])
            f_g = jax.nn.sigmoid(gates[:, 1 * H:2 * H])
            g_g = jnp.tanh(gates[:, 2 * H:3 * H])
            o_g = jax.nn.sigmoid(gates[:, 3 * H:4 * H])
            c = f_g * c + i_g * g_g
            h = o_g * jnp.tanh(c)
            outs.append(h)
        inp = jnp.stack(outs, axis=1)
    return inp[:, -1, :] @ fc_w_t + fc_b


# ----------------------------------------------------------------------------
# Parameter init (deterministic, matches nn.LSTM / nn.Linear shapes)
# ----------------------------------------------------------------------------
def init_params(key, input_dim, hidden_dim, num_layers, output_dim):
    H = hidden_dim
    k = 1.0 / math.sqrt(H)
    layer_params = []
    for layer in range(num_layers):
        din = input_dim if layer == 0 else H
        key, k1, k2, k3, k4 = jax.random.split(key, 5)
        w_ih = jax.random.uniform(k1, (4 * H, din), jnp.float32, -k, k)
        w_hh = jax.random.uniform(k2, (4 * H, H), jnp.float32, -k, k)
        b_ih = jax.random.uniform(k3, (4 * H,), jnp.float32, -k, k)
        b_hh = jax.random.uniform(k4, (4 * H,), jnp.float32, -k, k)
        # store transposed + combined bias
        layer_params.append((w_ih.T, w_hh.T, (b_ih + b_hh)[None, :]))
    key, k5, k6 = jax.random.split(key, 3)
    fc_w = jax.random.uniform(k5, (output_dim, H), jnp.float32, -k, k)
    fc_b = jax.random.uniform(k6, (output_dim,), jnp.float32, -k, k)
    return layer_params, fc_w.T, fc_b[None, :]


# ----------------------------------------------------------------------------
if __name__ == "__main__":
    B, T = 2, 8
    input_dim, hidden_dim, num_layers, output_dim = 4, 32, 2, 8

    key = jax.random.PRNGKey(0)
    key, xkey = jax.random.split(key)
    x = jax.random.normal(xkey, (B, T, input_dim), jnp.float32)

    layer_params, fc_w_t, fc_b = init_params(
        key, input_dim, hidden_dim, num_layers, output_dim)

    out = lstm_model_forward(x, layer_params, fc_w_t, fc_b, hidden_dim)
    out = jax.block_until_ready(out)

    ref = lstm_model_ref(x, layer_params, fc_w_t, fc_b, hidden_dim)
    assert out.shape == (B, output_dim)
    assert jnp.allclose(out, ref, atol=1e-4, rtol=1e-4), "mismatch vs reference"

    print("KERNEL_OK")
</pallas_src>

<mosaic_0001>
module attributes {stable_mosaic.version = 11 : i64} {
  func.func @fused_lstm_fc_kernel(%arg0: memref<16x4xf32, #tpu.memory_space<vmem>>, %arg1: memref<4x128xf32, #tpu.memory_space<vmem>>, %arg2: memref<32x128xf32, #tpu.memory_space<vmem>>, %arg3: memref<1x128xf32, #tpu.memory_space<vmem>>, %arg4: memref<32x128xf32, #tpu.memory_space<vmem>>, %arg5: memref<32x128xf32, #tpu.memory_space<vmem>>, %arg6: memref<1x128xf32, #tpu.memory_space<vmem>>, %arg7: memref<32x8xf32, #tpu.memory_space<vmem>>, %arg8: memref<1x8xf32, #tpu.memory_space<vmem>>, %arg9: memref<2x8xf32, #tpu.memory_space<vmem>>) attributes {dimension_semantics = [], scalar_prefetch = 0 : i64, scratch_operands = 0 : i64, tpu.core_type = #tpu.core_type<tc>} {
    %c0 = arith.constant 0 : index
    %c0_0 = arith.constant 0 : index
    %0 = vector.load %arg0[%c0, %c0_0] : memref<16x4xf32, #tpu.memory_space<vmem>>, vector<16x4xf32>
    %c0_1 = arith.constant 0 : index
    %c0_2 = arith.constant 0 : index
    %1 = vector.load %arg1[%c0_1, %c0_2] : memref<4x128xf32, #tpu.memory_space<vmem>>, vector<4x128xf32>
    %cst = arith.constant dense<0.000000e+00> : vector<16x128xf32>
    %2 = tpu.matmul %0, %1, %cst {dimension_numbers = #tpu.dot_dimension_numbers<[1], [0], [0], [1], [0, 0, 1, 1], [], []>} : vector<16x4xf32>, vector<4x128xf32>, vector<16x128xf32> -> vector<16x128xf32>
    %c0_3 = arith.constant 0 : index
    %c0_4 = arith.constant 0 : index
    %3 = vector.load %arg3[%c0_3, %c0_4] : memref<1x128xf32, #tpu.memory_space<vmem>>, vector<1x128xf32>
    %4 = vector.broadcast %3 : vector<1x128xf32> to vector<16x128xf32>
    %5 = arith.addf %2, %4 : vector<16x128xf32>
    %c0_5 = arith.constant 0 : index
    %c0_6 = arith.constant 0 : index
    %6 = vector.load %arg2[%c0_5, %c0_6] : memref<32x128xf32, #tpu.memory_space<vmem>>, vector<32x128xf32>
    %cst_7 = arith.constant 0.000000e+00 : f32
    %7 = vector.broadcast %cst_7 : f32 to vector<2x32xf32>
    %cst_8 = arith.constant 0.000000e+00 : f32
    %8 = vector.broadcast %cst_8 : f32 to vector<2x32xf32>
    %9 = vector.extract_strided_slice %5 {offsets = [0, 0], sizes = [2, 128], strides = [1, 1]} : vector<16x128xf32> to vector<2x128xf32>
    %cst_9 = arith.constant dense<0.000000e+00> : vector<2x128xf32>
    %10 = tpu.matmul %7, %6, %cst_9 {dimension_numbers = #tpu.dot_dimension_numbers<[1], [0], [0], [1], [0, 0, 1, 1], [], []>} : vector<2x32xf32>, vector<32x128xf32>, vector<2x128xf32> -> vector<2x128xf32>
    %11 = arith.addf %9, %10 : vector<2x128xf32>
    %12 = arith.negf %11 : vector<2x128xf32>
    %13 = math.exp %12 : vector<2x128xf32>
    %cst_10 = arith.constant 1.000000e+00 : f32
    %14 = vector.broadcast %cst_10 : f32 to vector<2x128xf32>
    %15 = arith.addf %14, %13 : vector<2x128xf32>
    %16 = arith.divf %14, %15 : vector<2x128xf32>
    %17 = vector.extract_strided_slice %16 {offsets = [0, 0], sizes = [2, 32], strides = [1, 1]} : vector<2x128xf32> to vector<2x32xf32>
    %18 = vector.extract_strided_slice %16 {offsets = [0, 32], sizes = [2, 32], strides = [1, 1]} : vector<2x128xf32> to vector<2x32xf32>
    %19 = vector.extract_strided_slice %16 {offsets = [0, 64], sizes = [2, 32], strides = [1, 1]} : vector<2x128xf32> to vector<2x32xf32>
    %cst_11 = arith.constant 2.000000e+00 : f32
    %20 = vector.broadcast %cst_11 : f32 to vector<2x32xf32>
    %21 = arith.mulf %20, %19 : vector<2x32xf32>
    %cst_12 = arith.constant 1.000000e+00 : f32
    %22 = vector.broadcast %cst_12 : f32 to vector<2x32xf32>
    %23 = arith.subf %21, %22 : vector<2x32xf32>
    %24 = vector.extract_strided_slice %16 {offsets = [0, 96], sizes = [2, 32], strides = [1, 1]} : vector<2x128xf32> to vector<2x32xf32>
    %25 = arith.mulf %18, %8 : vector<2x32xf32>
    %26 = arith.mulf %17, %23 : vector<2x32xf32>
    %27 = arith.addf %25, %26 : vector<2x32xf32>
    %28 = math.tanh %27 : vector<2x32xf32>
    %29 = arith.mulf %24, %28 : vector<2x32xf32>
    %30 = vector.extract_strided_slice %5 {offsets = [2, 0], sizes = [2, 128], strides = [1, 1]} : vector<16x128xf32> to vector<2x128xf32>
    %cst_13 = arith.constant dense<0.000000e+00> : vector<2x128xf32>
    %31 = tpu.matmul %29, %6, %cst_13 {dimension_numbers = #tpu.dot_dimension_numbers<[1], [0], [0], [1], [0, 0, 1, 1], [], []>} : vector<2x32xf32>, vector<32x128xf32>, vector<2x128xf32> -> vector<2x128xf32>
    %32 = arith.addf %30, %31 : vector<2x128xf32>
    %33 = arith.negf %32 : vector<2x128xf32>
    %34 = math.exp %33 : vector<2x128xf32>
    %cst_14 = arith.constant 1.000000e+00 : f32
    %35 = vector.broadcast %cst_14 : f32 to vector<2x128xf32>
    %36 = arith.addf %35, %34 : vector<2x128xf32>
    %37 = arith.divf %35, %36 : vector<2x128xf32>
    %38 = vector.extract_strided_slice %37 {offsets = [0, 0], sizes = [2, 32], strides = [1, 1]} : vector<2x128xf32> to vector<2x32xf32>
    %39 = vector.extract_strided_slice %37 {offsets = [0, 32], sizes = [2, 32], strides = [1, 1]} : vector<2x128xf32> to vector<2x32xf32>
    %40 = vector.extract_strided_slice %37 {offsets = [0, 64], sizes = [2, 32], strides = [1, 1]} : vector<2x128xf32> to vector<2x32xf32>
    %cst_15 = arith.constant 2.000000e+00 : f32
    %41 = vector.broadcast %cst_15 : f32 to vector<2x32xf32>
    %42 = arith.mulf %41, %40 : vector<2x32xf32>
    %cst_16 = arith.constant 1.000000e+00 : f32
    %43 = vector.broadcast %cst_16 : f32 to vector<2x32xf32>
    %44 = arith.subf %42, %43 : vector<2x32xf32>
    %45 = vector.extract_strided_slice %37 {offsets = [0, 96], sizes = [2, 32], strides = [1, 1]} : vector<2x128xf32> to vector<2x32xf32>
    %46 = arith.mulf %39, %27 : vector<2x32xf32>
    %47 = arith.mulf %38, %44 : vector<2x32xf32>
    %48 = arith.addf %46, %47 : vector<2x32xf32>
    %49 = math.tanh %48 : vector<2x32xf32>
    %50 = arith.mulf %45, %49 : vector<2x32xf32>
    %51 = vector.extract_strided_slice %5 {offsets = [4, 0], sizes = [2, 128], strides = [1, 1]} : vector<16x128xf32> to vector<2x128xf32>
    %cst_17 = arith.constant dense<0.000000e+00> : vector<2x128xf32>
    %52 = tpu.matmul %50, %6, %cst_17 {dimension_numbers = #tpu.dot_dimension_numbers<[1], [0], [0], [1], [0, 0, 1, 1], [], []>} : vector<2x32xf32>, vector<32x128xf32>, vector<2x128xf32> -> vector<2x128xf32>
    %53 = arith.addf %51, %52 : vector<2x128xf32>
    %54 = arith.negf %53 : vector<2x128xf32>
    %55 = math.exp %54 : vector<2x128xf32>
    %cst_18 = arith.constant 1.000000e+00 : f32
    %56 = vector.broadcast %cst_18 : f32 to vector<2x128xf32>
    %57 = arith.addf %56, %55 : vector<2x128xf32>
    %58 = arith.divf %56, %57 : vector<2x128xf32>
    %59 = vector.extract_strided_slice %58 {offsets = [0, 0], sizes = [2, 32], strides = [1, 1]} : vector<2x128xf32> to vector<2x32xf32>
    %60 = vector.extract_strided_slice %58 {offsets = [0, 32], sizes = [2, 32], strides = [1, 1]} : vector<2x128xf32> to vector<2x32xf32>
    %61 = vector.extract_strided_slice %58 {offsets = [0, 64], sizes = [2, 32], strides = [1, 1]} : vector<2x128xf32> to vector<2x32xf32>
    %cst_19 = arith.constant 2.000000e+00 : f32
    %62 = vector.broadcast %cst_19 : f32 to vector<2x32xf32>
    %63 = arith.mulf %62, %61 : vector<2x32xf32>
    %cst_20 = arith.constant 1.000000e+00 : f32
    %64 = vector.broadcast %cst_20 : f32 to vector<2x32xf32>
    %65 = arith.subf %63, %64 : vector<2x32xf32>
    %66 = vector.extract_strided_slice %58 {offsets = [0, 96], sizes = [2, 32], strides = [1, 1]} : vector<2x128xf32> to vector<2x32xf32>
    %67 = arith.mulf %60, %48 : vector<2x32xf32>
    %68 = arith.mulf %59, %65 : vector<2x32xf32>
    %69 = arith.addf %67, %68 : vector<2x32xf32>
    %70 = math.tanh %69 : vector<2x32xf32>
    %71 = arith.mulf %66, %70 : vector<2x32xf32>
    %72 = vector.extract_strided_slice %5 {offsets = [6, 0], sizes = [2, 128], strides = [1, 1]} : vector<16x128xf32> to vector<2x128xf32>
    %cst_21 = arith.constant dense<0.000000e+00> : vector<2x128xf32>
    %73 = tpu.matmul %71, %6, %cst_21 {dimension_numbers = #tpu.dot_dimension_numbers<[1], [0], [0], [1], [0, 0, 1, 1], [], []>} : vector<2x32xf32>, vector<32x128xf32>, vector<2x128xf32> -> vector<2x128xf32>
    %74 = arith.addf %72, %73 : vector<2x128xf32>
    %75 = arith.negf %74 : vector<2x128xf32>
    %76 = math.exp %75 : vector<2x128xf32>
    %cst_22 = arith.constant 1.000000e+00 : f32
    %77 = vector.broadcast %cst_22 : f32 to vector<2x128xf32>
    %78 = arith.addf %77, %76 : vector<2x128xf32>
    %79 = arith.divf %77, %78 : vector<2x128xf32>
    %80 = vector.extract_strided_slice %79 {offsets = [0, 0], sizes = [2, 32], strides = [1, 1]} : vector<2x128xf32> to vector<2x32xf32>
    %81 = vector.extract_strided_slice %79 {offsets = [0, 32], sizes = [2, 32], strides = [1, 1]} : vector<2x128xf32> to vector<2x32xf32>
    %82 = vector.extract_strided_slice %79 {offsets = [0, 64], sizes = [2, 32], strides = [1, 1]} : vector<2x128xf32> to vector<2x32xf32>
    %cst_23 = arith.constant 2.000000e+00 : f32
    %83 = vector.broadcast %cst_23 : f32 to vector<2x32xf32>
    %84 = arith.mulf %83, %82 : vector<2x32xf32>
    %cst_24 = arith.constant 1.000000e+00 : f32
    %85 = vector.broadcast %cst_24 : f32 to vector<2x32xf32>
    %86 = arith.subf %84, %85 : vector<2x32xf32>
    %87 = vector.extract_strided_slice %79 {offsets = [0, 96], sizes = [2, 32], strides = [1, 1]} : vector<2x128xf32> to vector<2x32xf32>
    %88 = arith.mulf %81, %69 : vector<2x32xf32>
    %89 = arith.mulf %80, %86 : vector<2x32xf32>
    %90 = arith.addf %88, %89 : vector<2x32xf32>
    %91 = math.tanh %90 : vector<2x32xf32>
    %92 = arith.mulf %87, %91 : vector<2x32xf32>
    %93 = vector.extract_strided_slice %5 {offsets = [8, 0], sizes = [2, 128], strides = [1, 1]} : vector<16x128xf32> to vector<2x128xf32>
    %cst_25 = arith.constant dense<0.000000e+00> : vector<2x128xf32>
    %94 = tpu.matmul %92, %6, %cst_25 {dimension_numbers = #tpu.dot_dimension_numbers<[1], [0], [0], [1], [0, 0, 1, 1], [], []>} : vector<2x32xf32>, vector<32x128xf32>, vector<2x128xf32> -> vector<2x128xf32>
    %95 = arith.addf %93, %94 : vector<2x128xf32>
    %96 = arith.negf %95 : vector<2x128xf32>
    %97 = math.exp %96 : vector<2x128xf32>
    %cst_26 = arith.constant 1.000000e+00 : f32
    %98 = vector.broadcast %cst_26 : f32 to vector<2x128xf32>
    %99 = arith.addf %98, %97 : vector<2x128xf32>
    %100 = arith.divf %98, %99 : vector<2x128xf32>
    %101 = vector.extract_strided_slice %100 {offsets = [0, 0], sizes = [2, 32], strides = [1, 1]} : vector<2x128xf32> to vector<2x32xf32>
    %102 = vector.extract_strided_slice %100 {offsets = [0, 32], sizes = [2, 32], strides = [1, 1]} : vector<2x128xf32> to vector<2x32xf32>
    %103 = vector.extract_strided_slice %100 {offsets = [0, 64], sizes = [2, 32], strides = [1, 1]} : vector<2x128xf32> to vector<2x32xf32>
    %cst_27 = arith.constant 2.000000e+00 : f32
    %104 = vector.broadcast %cst_27 : f32 to vector<2x32xf32>
    %105 = arith.mulf %104, %103 : vector<2x32xf32>
    %cst_28 = arith.constant 1.000000e+00 : f32
    %106 = vector.broadcast %cst_28 : f32 to vector<2x32xf32>
    %107 = arith.subf %105, %106 : vector<2x32xf32>
    %108 = vector.extract_strided_slice %100 {offsets = [0, 96], sizes = [2, 32], strides = [1, 1]} : vector<2x128xf32> to vector<2x32xf32>
    %109 = arith.mulf %102, %90 : vector<2x32xf32>
    %110 = arith.mulf %101, %107 : vector<2x32xf32>
    %111 = arith.addf %109, %110 : vector<2x32xf32>
    %112 = math.tanh %111 : vector<2x32xf32>
    %113 = arith.mulf %108, %112 : vector<2x32xf32>
    %114 = vector.extract_strided_slice %5 {offsets = [10, 0], sizes = [2, 128], strides = [1, 1]} : vector<16x128xf32> to vector<2x128xf32>
    %cst_29 = arith.constant dense<0.000000e+00> : vector<2x128xf32>
    %115 = tpu.matmul %113, %6, %cst_29 {dimension_numbers = #tpu.dot_dimension_numbers<[1], [0], [0], [1], [0, 0, 1, 1], [], []>} : vector<2x32xf32>, vector<32x128xf32>, vector<2x128xf32> -> vector<2x128xf32>
    %116 = arith.addf %114, %115 : vector<2x128xf32>
    %117 = arith.negf %116 : vector<2x128xf32>
    %118 = math.exp %117 : vector<2x128xf32>
    %cst_30 = arith.constant 1.000000e+00 : f32
    %119 = vector.broadcast %cst_30 : f32 to vector<2x128xf32>
    %120 = arith.addf %119, %118 : vector<2x128xf32>
    %121 = arith.divf %119, %120 : vector<2x128xf32>
    %122 = vector.extract_strided_slice %121 {offsets = [0, 0], sizes = [2, 32], strides = [1, 1]} : vector<2x128xf32> to vector<2x32xf32>
    %123 = vector.extract_strided_slice %121 {offsets = [0, 32], sizes = [2, 32], strides = [1, 1]} : vector<2x128xf32> to vector<2x32xf32>
    %124 = vector.extract_strided_slice %121 {offsets = [0, 64], sizes = [2, 32], strides = [1, 1]} : vector<2x128xf32> to vector<2x32xf32>
    %cst_31 = arith.constant 2.000000e+00 : f32
    %125 = vector.broadcast %cst_31 : f32 to vector<2x32xf32>
    %126 = arith.mulf %125, %124 : vector<2x32xf32>
    %cst_32 = arith.constant 1.000000e+00 : f32
    %127 = vector.broadcast %cst_32 : f32 to vector<2x32xf32>
    %128 = arith.subf %126, %127 : vector<2x32xf32>
    %129 = vector.extract_strided_slice %121 {offsets = [0, 96], sizes = [2, 32], strides = [1, 1]} : vector<2x128xf32> to vector<2x32xf32>
    %130 = arith.mulf %123, %111 : vector<2x32xf32>
    %131 = arith.mulf %122, %128 : vector<2x32xf32>
    %132 = arith.addf %130, %131 : vector<2x32xf32>
    %133 = math.tanh %132 : vector<2x32xf32>
    %134 = arith.mulf %129, %133 : vector<2x32xf32>
    %135 = vector.extract_strided_slice %5 {offsets = [12, 0], sizes = [2, 128], strides = [1, 1]} : vector<16x128xf32> to vector<2x128xf32>
    %cst_33 = arith.constant dense<0.000000e+00> : vector<2x128xf32>
    %136 = tpu.matmul %134, %6, %cst_33 {dimension_numbers = #tpu.dot_dimension_numbers<[1], [0], [0], [1], [0, 0, 1, 1], [], []>} : vector<2x32xf32>, vector<32x128xf32>, vector<2x128xf32> -> vector<2x128xf32>
    %137 = arith.addf %135, %136 : vector<2x128xf32>
    %138 = arith.negf %137 : vector<2x128xf32>
    %139 = math.exp %138 : vector<2x128xf32>
    %cst_34 = arith.constant 1.000000e+00 : f32
    %140 = vector.broadcast %cst_34 : f32 to vector<2x128xf32>
    %141 = arith.addf %140, %139 : vector<2x128xf32>
    %142 = arith.divf %140, %141 : vector<2x128xf32>
    %143 = vector.extract_strided_slice %142 {offsets = [0, 0], sizes = [2, 32], strides = [1, 1]} : vector<2x128xf32> to vector<2x32xf32>
    %144 = vector.extract_strided_slice %142 {offsets = [0, 32], sizes = [2, 32], strides = [1, 1]} : vector<2x128xf32> to vector<2x32xf32>
    %145 = vector.extract_strided_slice %142 {offsets = [0, 64], sizes = [2, 32], strides = [1, 1]} : vector<2x128xf32> to vector<2x32xf32>
    %cst_35 = arith.constant 2.000000e+00 : f32
    %146 = vector.broadcast %cst_35 : f32 to vector<2x32xf32>
    %147 = arith.mulf %146, %145 : vector<2x32xf32>
    %cst_36 = arith.constant 1.000000e+00 : f32
    %148 = vector.broadcast %cst_36 : f32 to vector<2x32xf32>
    %149 = arith.subf %147, %148 : vector<2x32xf32>
    %150 = vector.extract_strided_slice %142 {offsets = [0, 96], sizes = [2, 32], strides = [1, 1]} : vector<2x128xf32> to vector<2x32xf32>
    %151 = arith.mulf %144, %132 : vector<2x32xf32>
    %152 = arith.mulf %143, %149 : vector<2x32xf32>
    %153 = arith.addf %151, %152 : vector<2x32xf32>
    %154 = math.tanh %153 : vector<2x32xf32>
    %155 = arith.mulf %150, %154 : vector<2x32xf32>
    %156 = vector.extract_strided_slice %5 {offsets = [14, 0], sizes = [2, 128], strides = [1, 1]} : vector<16x128xf32> to vector<2x128xf32>
    %cst_37 = arith.constant dense<0.000000e+00> : vector<2x128xf32>
    %157 = tpu.matmul %155, %6, %cst_37 {dimension_numbers = #tpu.dot_dimension_numbers<[1], [0], [0], [1], [0, 0, 1, 1], [], []>} : vector<2x32xf32>, vector<32x128xf32>, vector<2x128xf32> -> vector<2x128xf32>
    %158 = arith.addf %156, %157 : vector<2x128xf32>
    %159 = arith.negf %158 : vector<2x128xf32>
    %160 = math.exp %159 : vector<2x128xf32>
    %cst_38 = arith.constant 1.000000e+00 : f32
    %161 = vector.broadcast %cst_38 : f32 to vector<2x128xf32>
    %162 = arith.addf %161, %160 : vector<2x128xf32>
    %163 = arith.divf %161, %162 : vector<2x128xf32>
    %164 = vector.extract_strided_slice %163 {offsets = [0, 0], sizes = [2, 32], strides = [1, 1]} : vector<2x128xf32> to vector<2x32xf32>
    %165 = vector.extract_strided_slice %163 {offsets = [0, 32], sizes = [2, 32], strides = [1, 1]} : vector<2x128xf32> to vector<2x32xf32>
    %166 = vector.extract_strided_slice %163 {offsets = [0, 64], sizes = [2, 32], strides = [1, 1]} : vector<2x128xf32> to vector<2x32xf32>
    %cst_39 = arith.constant 2.000000e+00 : f32
    %167 = vector.broadcast %cst_39 : f32 to vector<2x32xf32>
    %168 = arith.mulf %167, %166 : vector<2x32xf32>
    %cst_40 = arith.constant 1.000000e+00 : f32
    %169 = vector.broadcast %cst_40 : f32 to vector<2x32xf32>
    %170 = arith.subf %168, %169 : vector<2x32xf32>
    %171 = vector.extract_strided_slice %163 {offsets = [0, 96], sizes = [2, 32], strides = [1, 1]} : vector<2x128xf32> to vector<2x32xf32>
    %172 = arith.mulf %165, %153 : vector<2x32xf32>
    %173 = arith.mulf %164, %170 : vector<2x32xf32>
    %174 = arith.addf %172, %173 : vector<2x32xf32>
    %175 = math.tanh %174 : vector<2x32xf32>
    %176 = arith.mulf %171, %175 : vector<2x32xf32>
    %177 = tpu.concatenate %29, %50, %71, %92, %113, %134, %155, %176 in 0 : vector<2x32xf32>, vector<2x32xf32>, vector<2x32xf32>, vector<2x32xf32>, vector<2x32xf32>, vector<2x32xf32>, vector<2x32xf32>, vector<2x32xf32> -> vector<16x32xf32>
    %c0_41 = arith.constant 0 : index
    %c0_42 = arith.constant 0 : index
    %178 = vector.load %arg4[%c0_41, %c0_42] : memref<32x128xf32, #tpu.memory_space<vmem>>, vector<32x128xf32>
    %cst_43 = arith.constant dense<0.000000e+00> : vector<16x128xf32>
    %179 = tpu.matmul %177, %178, %cst_43 {dimension_numbers = #tpu.dot_dimension_numbers<[1], [0], [0], [1], [0, 0, 1, 1], [], []>} : vector<16x32xf32>, vector<32x128xf32>, vector<16x128xf32> -> vector<16x128xf32>
    %c0_44 = arith.constant 0 : index
    %c0_45 = arith.constant 0 : index
    %180 = vector.load %arg6[%c0_44, %c0_45] : memref<1x128xf32, #tpu.memory_space<vmem>>, vector<1x128xf32>
    %181 = vector.broadcast %180 : vector<1x128xf32> to vector<16x128xf32>
    %182 = arith.addf %179, %181 : vector<16x128xf32>
    %c0_46 = arith.constant 0 : index
    %c0_47 = arith.constant 0 : index
    %183 = vector.load %arg5[%c0_46, %c0_47] : memref<32x128xf32, #tpu.memory_space<vmem>>, vector<32x128xf32>
    %cst_48 = arith.constant 0.000000e+00 : f32
    %184 = vector.broadcast %cst_48 : f32 to vector<2x32xf32>
    %cst_49 = arith.constant 0.000000e+00 : f32
    %185 = vector.broadcast %cst_49 : f32 to vector<2x32xf32>
    %186 = vector.extract_strided_slice %182 {offsets = [0, 0], sizes = [2, 128], strides = [1, 1]} : vector<16x128xf32> to vector<2x128xf32>
    %cst_50 = arith.constant dense<0.000000e+00> : vector<2x128xf32>
    %187 = tpu.matmul %184, %183, %cst_50 {dimension_numbers = #tpu.dot_dimension_numbers<[1], [0], [0], [1], [0, 0, 1, 1], [], []>} : vector<2x32xf32>, vector<32x128xf32>, vector<2x128xf32> -> vector<2x128xf32>
    %188 = arith.addf %186, %187 : vector<2x128xf32>
    %189 = arith.negf %188 : vector<2x128xf32>
    %190 = math.exp %189 : vector<2x128xf32>
    %cst_51 = arith.constant 1.000000e+00 : f32
    %191 = vector.broadcast %cst_51 : f32 to vector<2x128xf32>
    %192 = arith.addf %191, %190 : vector<2x128xf32>
    %193 = arith.divf %191, %192 : vector<2x128xf32>
    %194 = vector.extract_strided_slice %193 {offsets = [0, 0], sizes = [2, 32], strides = [1, 1]} : vector<2x128xf32> to vector<2x32xf32>
    %195 = vector.extract_strided_slice %193 {offsets = [0, 32], sizes = [2, 32], strides = [1, 1]} : vector<2x128xf32> to vector<2x32xf32>
    %196 = vector.extract_strided_slice %193 {offsets = [0, 64], sizes = [2, 32], strides = [1, 1]} : vector<2x128xf32> to vector<2x32xf32>
    %cst_52 = arith.constant 2.000000e+00 : f32
    %197 = vector.broadcast %cst_52 : f32 to vector<2x32xf32>
    %198 = arith.mulf %197, %196 : vector<2x32xf32>
    %cst_53 = arith.constant 1.000000e+00 : f32
    %199 = vector.broadcast %cst_53 : f32 to vector<2x32xf32>
    %200 = arith.subf %198, %199 : vector<2x32xf32>
    %201 = vector.extract_strided_slice %193 {offsets = [0, 96], sizes = [2, 32], strides = [1, 1]} : vector<2x128xf32> to vector<2x32xf32>
    %202 = arith.mulf %195, %185 : vector<2x32xf32>
    %203 = arith.mulf %194, %200 : vector<2x32xf32>
    %204 = arith.addf %202, %203 : vector<2x32xf32>
    %205 = math.tanh %204 : vector<2x32xf32>
    %206 = arith.mulf %201, %205 : vector<2x32xf32>
    %207 = vector.extract_strided_slice %182 {offsets = [2, 0], sizes = [2, 128], strides = [1, 1]} : vector<16x128xf32> to vector<2x128xf32>
    %cst_54 = arith.constant dense<0.000000e+00> : vector<2x128xf32>
    %208 = tpu.matmul %206, %183, %cst_54 {dimension_numbers = #tpu.dot_dimension_numbers<[1], [0], [0], [1], [0, 0, 1, 1], [], []>} : vector<2x32xf32>, vector<32x128xf32>, vector<2x128xf32> -> vector<2x128xf32>
    %209 = arith.addf %207, %208 : vector<2x128xf32>
    %210 = arith.negf %209 : vector<2x128xf32>
    %211 = math.exp %210 : vector<2x128xf32>
    %cst_55 = arith.constant 1.000000e+00 : f32
    %212 = vector.broadcast %cst_55 : f32 to vector<2x128xf32>
    %213 = arith.addf %212, %211 : vector<2x128xf32>
    %214 = arith.divf %212, %213 : vector<2x128xf32>
    %215 = vector.extract_strided_slice %214 {offsets = [0, 0], sizes = [2, 32], strides = [1, 1]} : vector<2x128xf32> to vector<2x32xf32>
    %216 = vector.extract_strided_slice %214 {offsets = [0, 32], sizes = [2, 32], strides = [1, 1]} : vector<2x128xf32> to vector<2x32xf32>
    %217 = vector.extract_strided_slice %214 {offsets = [0, 64], sizes = [2, 32], strides = [1, 1]} : vector<2x128xf32> to vector<2x32xf32>
    %cst_56 = arith.constant 2.000000e+00 : f32
    %218 = vector.broadcast %cst_56 : f32 to vector<2x32xf32>
    %219 = arith.mulf %218, %217 : vector<2x32xf32>
    %cst_57 = arith.constant 1.000000e+00 : f32
    %220 = vector.broadcast %cst_57 : f32 to vector<2x32xf32>
    %221 = arith.subf %219, %220 : vector<2x32xf32>
    %222 = vector.extract_strided_slice %214 {offsets = [0, 96], sizes = [2, 32], strides = [1, 1]} : vector<2x128xf32> to vector<2x32xf32>
    %223 = arith.mulf %216, %204 : vector<2x32xf32>
    %224 = arith.mulf %215, %221 : vector<2x32xf32>
    %225 = arith.addf %223, %224 : vector<2x32xf32>
    %226 = math.tanh %225 : vector<2x32xf32>
    %227 = arith.mulf %222, %226 : vector<2x32xf32>
    %228 = vector.extract_strided_slice %182 {offsets = [4, 0], sizes = [2, 128], strides = [1, 1]} : vector<16x128xf32> to vector<2x128xf32>
    %cst_58 = arith.constant dense<0.000000e+00> : vector<2x128xf32>
    %229 = tpu.matmul %227, %183, %cst_58 {dimension_numbers = #tpu.dot_dimension_numbers<[1], [0], [0], [1], [0, 0, 1, 1], [], []>} : vector<2x32xf32>, vector<32x128xf32>, vector<2x128xf32> -> vector<2x128xf32>
    %230 = arith.addf %228, %229 : vector<2x128xf32>
    %231 = arith.negf %230 : vector<2x128xf32>
    %232 = math.exp %231 : vector<2x128xf32>
    %cst_59 = arith.constant 1.000000e+00 : f32
    %233 = vector.broadcast %cst_59 : f32 to vector<2x128xf32>
    %234 = arith.addf %233, %232 : vector<2x128xf32>
    %235 = arith.divf %233, %234 : vector<2x128xf32>
    %236 = vector.extract_strided_slice %235 {offsets = [0, 0], sizes = [2, 32], strides = [1, 1]} : vector<2x128xf32> to vector<2x32xf32>
    %237 = vector.extract_strided_slice %235 {offsets = [0, 32], sizes = [2, 32], strides = [1, 1]} : vector<2x128xf32> to vector<2x32xf32>
    %238 = vector.extract_strided_slice %235 {offsets = [0, 64], sizes = [2, 32], strides = [1, 1]} : vector<2x128xf32> to vector<2x32xf32>
    %cst_60 = arith.constant 2.000000e+00 : f32
    %239 = vector.broadcast %cst_60 : f32 to vector<2x32xf32>
    %240 = arith.mulf %239, %238 : vector<2x32xf32>
    %cst_61 = arith.constant 1.000000e+00 : f32
    %241 = vector.broadcast %cst_61 : f32 to vector<2x32xf32>
    %242 = arith.subf %240, %241 : vector<2x32xf32>
    %243 = vector.extract_strided_slice %235 {offsets = [0, 96], sizes = [2, 32], strides = [1, 1]} : vector<2x128xf32> to vector<2x32xf32>
    %244 = arith.mulf %237, %225 : vector<2x32xf32>
    %245 = arith.mulf %236, %242 : vector<2x32xf32>
    %246 = arith.addf %244, %245 : vector<2x32xf32>
    %247 = math.tanh %246 : vector<2x32xf32>
    %248 = arith.mulf %243, %247 : vector<2x32xf32>
    %249 = vector.extract_strided_slice %182 {offsets = [6, 0], sizes = [2, 128], strides = [1, 1]} : vector<16x128xf32> to vector<2x128xf32>
    %cst_62 = arith.constant dense<0.000000e+00> : vector<2x128xf32>
    %250 = tpu.matmul %248, %183, %cst_62 {dimension_numbers = #tpu.dot_dimension_numbers<[1], [0], [0], [1], [0, 0, 1, 1], [], []>} : vector<2x32xf32>, vector<32x128xf32>, vector<2x128xf32> -> vector<2x128xf32>
    %251 = arith.addf %249, %250 : vector<2x128xf32>
    %252 = arith.negf %251 : vector<2x128xf32>
    %253 = math.exp %252 : vector<2x128xf32>
    %cst_63 = arith.constant 1.000000e+00 : f32
    %254 = vector.broadcast %cst_63 : f32 to vector<2x128xf32>
    %255 = arith.addf %254, %253 : vector<2x128xf32>
    %256 = arith.divf %254, %255 : vector<2x128xf32>
    %257 = vector.extract_strided_slice %256 {offsets = [0, 0], sizes = [2, 32], strides = [1, 1]} : vector<2x128xf32> to vector<2x32xf32>
    %258 = vector.extract_strided_slice %256 {offsets = [0, 32], sizes = [2, 32], strides = [1, 1]} : vector<2x128xf32> to vector<2x32xf32>
    %259 = vector.extract_strided_slice %256 {offsets = [0, 64], sizes = [2, 32], strides = [1, 1]} : vector<2x128xf32> to vector<2x32xf32>
    %cst_64 = arith.constant 2.000000e+00 : f32
    %260 = vector.broadcast %cst_64 : f32 to vector<2x32xf32>
    %261 = arith.mulf %260, %259 : vector<2x32xf32>
    %cst_65 = arith.constant 1.000000e+00 : f32
    %262 = vector.broadcast %cst_65 : f32 to vector<2x32xf32>
    %263 = arith.subf %261, %262 : vector<2x32xf32>
    %264 = vector.extract_strided_slice %256 {offsets = [0, 96], sizes = [2, 32], strides = [1, 1]} : vector<2x128xf32> to vector<2x32xf32>
    %265 = arith.mulf %258, %246 : vector<2x32xf32>
    %266 = arith.mulf %257, %263 : vector<2x32xf32>
    %267 = arith.addf %265, %266 : vector<2x32xf32>
    %268 = math.tanh %267 : vector<2x32xf32>
    %269 = arith.mulf %264, %268 : vector<2x32xf32>
    %270 = vector.extract_strided_slice %182 {offsets = [8, 0], sizes = [2, 128], strides = [1, 1]} : vector<16x128xf32> to vector<2x128xf32>
    %cst_66 = arith.constant dense<0.000000e+00> : vector<2x128xf32>
    %271 = tpu.matmul %269, %183, %cst_66 {dimension_numbers = #tpu.dot_dimension_numbers<[1], [0], [0], [1], [0, 0, 1, 1], [], []>} : vector<2x32xf32>, vector<32x128xf32>, vector<2x128xf32> -> vector<2x128xf32>
    %272 = arith.addf %270, %271 : vector<2x128xf32>
    %273 = arith.negf %272 : vector<2x128xf32>
    %274 = math.exp %273 : vector<2x128xf32>
    %cst_67 = arith.constant 1.000000e+00 : f32
    %275 = vector.broadcast %cst_67 : f32 to vector<2x128xf32>
    %276 = arith.addf %275, %274 : vector<2x128xf32>
    %277 = arith.divf %275, %276 : vector<2x128xf32>
    %278 = vector.extract_strided_slice %277 {offsets = [0, 0], sizes = [2, 32], strides = [1, 1]} : vector<2x128xf32> to vector<2x32xf32>
    %279 = vector.extract_strided_slice %277 {offsets = [0, 32], sizes = [2, 32], strides = [1, 1]} : vector<2x128xf32> to vector<2x32xf32>
    %280 = vector.extract_strided_slice %277 {offsets = [0, 64], sizes = [2, 32], strides = [1, 1]} : vector<2x128xf32> to vector<2x32xf32>
    %cst_68 = arith.constant 2.000000e+00 : f32
    %281 = vector.broadcast %cst_68 : f32 to vector<2x32xf32>
    %282 = arith.mulf %281, %280 : vector<2x32xf32>
    %cst_69 = arith.constant 1.000000e+00 : f32
    %283 = vector.broadcast %cst_69 : f32 to vector<2x32xf32>
    %284 = arith.subf %282, %283 : vector<2x32xf32>
    %285 = vector.extract_strided_slice %277 {offsets = [0, 96], sizes = [2, 32], strides = [1, 1]} : vector<2x128xf32> to vector<2x32xf32>
    %286 = arith.mulf %279, %267 : vector<2x32xf32>
    %287 = arith.mulf %278, %284 : vector<2x32xf32>
    %288 = arith.addf %286, %287 : vector<2x32xf32>
    %289 = math.tanh %288 : vector<2x32xf32>
    %290 = arith.mulf %285, %289 : vector<2x32xf32>
    %291 = vector.extract_strided_slice %182 {offsets = [10, 0], sizes = [2, 128], strides = [1, 1]} : vector<16x128xf32> to vector<2x128xf32>
    %cst_70 = arith.constant dense<0.000000e+00> : vector<2x128xf32>
    %292 = tpu.matmul %290, %183, %cst_70 {dimension_numbers = #tpu.dot_dimension_numbers<[1], [0], [0], [1], [0, 0, 1, 1], [], []>} : vector<2x32xf32>, vector<32x128xf32>, vector<2x128xf32> -> vector<2x128xf32>
    %293 = arith.addf %291, %292 : vector<2x128xf32>
    %294 = arith.negf %293 : vector<2x128xf32>
    %295 = math.exp %294 : vector<2x128xf32>
    %cst_71 = arith.constant 1.000000e+00 : f32
    %296 = vector.broadcast %cst_71 : f32 to vector<2x128xf32>
    %297 = arith.addf %296, %295 : vector<2x128xf32>
    %298 = arith.divf %296, %297 : vector<2x128xf32>
    %299 = vector.extract_strided_slice %298 {offsets = [0, 0], sizes = [2, 32], strides = [1, 1]} : vector<2x128xf32> to vector<2x32xf32>
    %300 = vector.extract_strided_slice %298 {offsets = [0, 32], sizes = [2, 32], strides = [1, 1]} : vector<2x128xf32> to vector<2x32xf32>
    %301 = vector.extract_strided_slice %298 {offsets = [0, 64], sizes = [2, 32], strides = [1, 1]} : vector<2x128xf32> to vector<2x32xf32>
    %cst_72 = arith.constant 2.000000e+00 : f32
    %302 = vector.broadcast %cst_72 : f32 to vector<2x32xf32>
    %303 = arith.mulf %302, %301 : vector<2x32xf32>
    %cst_73 = arith.constant 1.000000e+00 : f32
    %304 = vector.broadcast %cst_73 : f32 to vector<2x32xf32>
    %305 = arith.subf %303, %304 : vector<2x32xf32>
    %306 = vector.extract_strided_slice %298 {offsets = [0, 96], sizes = [2, 32], strides = [1, 1]} : vector<2x128xf32> to vector<2x32xf32>
    %307 = arith.mulf %300, %288 : vector<2x32xf32>
    %308 = arith.mulf %299, %305 : vector<2x32xf32>
    %309 = arith.addf %307, %308 : vector<2x32xf32>
    %310 = math.tanh %309 : vector<2x32xf32>
    %311 = arith.mulf %306, %310 : vector<2x32xf32>
    %312 = vector.extract_strided_slice %182 {offsets = [12, 0], sizes = [2, 128], strides = [1, 1]} : vector<16x128xf32> to vector<2x128xf32>
    %cst_74 = arith.constant dense<0.000000e+00> : vector<2x128xf32>
    %313 = tpu.matmul %311, %183, %cst_74 {dimension_numbers = #tpu.dot_dimension_numbers<[1], [0], [0], [1], [0, 0, 1, 1], [], []>} : vector<2x32xf32>, vector<32x128xf32>, vector<2x128xf32> -> vector<2x128xf32>
    %314 = arith.addf %312, %313 : vector<2x128xf32>
    %315 = arith.negf %314 : vector<2x128xf32>
    %316 = math.exp %315 : vector<2x128xf32>
    %cst_75 = arith.constant 1.000000e+00 : f32
    %317 = vector.broadcast %cst_75 : f32 to vector<2x128xf32>
    %318 = arith.addf %317, %316 : vector<2x128xf32>
    %319 = arith.divf %317, %318 : vector<2x128xf32>
    %320 = vector.extract_strided_slice %319 {offsets = [0, 0], sizes = [2, 32], strides = [1, 1]} : vector<2x128xf32> to vector<2x32xf32>
    %321 = vector.extract_strided_slice %319 {offsets = [0, 32], sizes = [2, 32], strides = [1, 1]} : vector<2x128xf32> to vector<2x32xf32>
    %322 = vector.extract_strided_slice %319 {offsets = [0, 64], sizes = [2, 32], strides = [1, 1]} : vector<2x128xf32> to vector<2x32xf32>
    %cst_76 = arith.constant 2.000000e+00 : f32
    %323 = vector.broadcast %cst_76 : f32 to vector<2x32xf32>
    %324 = arith.mulf %323, %322 : vector<2x32xf32>
    %cst_77 = arith.constant 1.000000e+00 : f32
    %325 = vector.broadcast %cst_77 : f32 to vector<2x32xf32>
    %326 = arith.subf %324, %325 : vector<2x32xf32>
    %327 = vector.extract_strided_slice %319 {offsets = [0, 96], sizes = [2, 32], strides = [1, 1]} : vector<2x128xf32> to vector<2x32xf32>
    %328 = arith.mulf %321, %309 : vector<2x32xf32>
    %329 = arith.mulf %320, %326 : vector<2x32xf32>
    %330 = arith.addf %328, %329 : vector<2x32xf32>
    %331 = math.tanh %330 : vector<2x32xf32>
    %332 = arith.mulf %327, %331 : vector<2x32xf32>
    %333 = vector.extract_strided_slice %182 {offsets = [14, 0], sizes = [2, 128], strides = [1, 1]} : vector<16x128xf32> to vector<2x128xf32>
    %cst_78 = arith.constant dense<0.000000e+00> : vector<2x128xf32>
    %334 = tpu.matmul %332, %183, %cst_78 {dimension_numbers = #tpu.dot_dimension_numbers<[1], [0], [0], [1], [0, 0, 1, 1], [], []>} : vector<2x32xf32>, vector<32x128xf32>, vector<2x128xf32> -> vector<2x128xf32>
    %335 = arith.addf %333, %334 : vector<2x128xf32>
    %336 = arith.negf %335 : vector<2x128xf32>
    %337 = math.exp %336 : vector<2x128xf32>
    %cst_79 = arith.constant 1.000000e+00 : f32
    %338 = vector.broadcast %cst_79 : f32 to vector<2x128xf32>
    %339 = arith.addf %338, %337 : vector<2x128xf32>
    %340 = arith.divf %338, %339 : vector<2x128xf32>
    %341 = vector.extract_strided_slice %340 {offsets = [0, 0], sizes = [2, 32], strides = [1, 1]} : vector<2x128xf32> to vector<2x32xf32>
    %342 = vector.extract_strided_slice %340 {offsets = [0, 32], sizes = [2, 32], strides = [1, 1]} : vector<2x128xf32> to vector<2x32xf32>
    %343 = vector.extract_strided_slice %340 {offsets = [0, 64], sizes = [2, 32], strides = [1, 1]} : vector<2x128xf32> to vector<2x32xf32>
    %cst_80 = arith.constant 2.000000e+00 : f32
    %344 = vector.broadcast %cst_80 : f32 to vector<2x32xf32>
    %345 = arith.mulf %344, %343 : vector<2x32xf32>
    %cst_81 = arith.constant 1.000000e+00 : f32
    %346 = vector.broadcast %cst_81 : f32 to vector<2x32xf32>
    %347 = arith.subf %345, %346 : vector<2x32xf32>
    %348 = vector.extract_strided_slice %340 {offsets = [0, 96], sizes = [2, 32], strides = [1, 1]} : vector<2x128xf32> to vector<2x32xf32>
    %349 = arith.mulf %342, %330 : vector<2x32xf32>
    %350 = arith.mulf %341, %347 : vector<2x32xf32>
    %351 = arith.addf %349, %350 : vector<2x32xf32>
    %352 = math.tanh %351 : vector<2x32xf32>
    %353 = arith.mulf %348, %352 : vector<2x32xf32>
    %c0_82 = arith.constant 0 : index
    %c0_83 = arith.constant 0 : index
    %354 = vector.load %arg7[%c0_82, %c0_83] : memref<32x8xf32, #tpu.memory_space<vmem>>, vector<32x8xf32>
    %cst_84 = arith.constant dense<0.000000e+00> : vector<2x8xf32>
    %355 = tpu.matmul %353, %354, %cst_84 {dimension_numbers = #tpu.dot_dimension_numbers<[1], [0], [0], [1], [0, 0, 1, 1], [], []>} : vector<2x32xf32>, vector<32x8xf32>, vector<2x8xf32> -> vector<2x8xf32>
    %c0_85 = arith.constant 0 : index
    %c0_86 = arith.constant 0 : index
    %356 = vector.load %arg8[%c0_85, %c0_86] : memref<1x8xf32, #tpu.memory_space<vmem>>, vector<1x8xf32>
    %357 = vector.broadcast %356 : vector<1x8xf32> to vector<2x8xf32>
    %358 = arith.addf %355, %357 : vector<2x8xf32>
    %c0_87 = arith.constant 0 : index
    %c0_88 = arith.constant 0 : index
    %359 = vector.load %arg9[%c0_87, %c0_88] : memref<2x8xf32, #tpu.memory_space<vmem>>, vector<2x8xf32>
    tpu.vector_store %arg9[%c0_87, %c0_88], %358 {strides = array<i32>} : memref<2x8xf32, #tpu.memory_space<vmem>>, vector<2x8xf32>,
    return
  }
}

</mosaic_0001>

<bundles_post_ra>
// kernel: tpu_custom_call.1
= control target key start
LH: loop header
LB: loop body
LE: loop exit
PB: predicated region body
PF: predicated region fallthrough
CT: control target
= control target key end

     0   :  { %14 = vsyncpa [#allocation3], 0  ;;  %s3099_s0 = inlined_call_operand.vmem [shape: f32[16,4], index: 0, kind: input, shape index: {}]   ;;  %s3100_s1 = inlined_call_operand.hbm [shape: f32[4,128], index: 1, kind: input, shape index: {}]   ;;  %s3101_s2 = inlined_call_operand.vmem [shape: f32[32,128], index: 2, kind: input, shape index: {}]   ;;  %s3102_s3 = inlined_call_operand.vmem [shape: f32[1,128], index: 3, kind: input, shape index: {}]   ;;  %s3103_s4 = inlined_call_operand.vmem [shape: f32[32,128], index: 4, kind: input, shape index: {}]   ;;  %s3104_s5 = inlined_call_operand.hbm [shape: f32[32,128], index: 5, kind: input, shape index: {}]   ;;  %s3105_s6 = inlined_call_operand.vmem [shape: f32[1,128], index: 6, kind: input, shape index: {}]   ;;  %s3106_s7 = inlined_call_operand.vmem [shape: f32[32,8], index: 7, kind: input, shape index: {}]   ;;  %s3107_s8 = inlined_call_operand.vmem [shape: f32[1,8], index: 8, kind: input, shape index: {}]   ;;  %s3108_s9 = inlined_call_operand.hbm [shape: f32[2,8], index: 9, kind: output, shape index: {}]  }
   0x1   :  { %15 = vsyncpa [#allocation6], 0 }
   0x2   :  { %16 = vsyncpa [#allocation4], 0  ;;  %s2710_s30 = smov [#allocation2]   ;;  %s2711_s11 = smov [#allocation5]  }
   0x3   :  { %s25_s10 = sshll.u32 %s2710_s30, 4  ;;  %s40_s12 = sshll.u32 %s2711_s11, 4  ;;  %s26_s10 = int_to_ptr.vmem [resolvable:$true] %s25_s10  ;;  %s2770_s12 = int_to_ptr.vmem [resolvable:$true] %s40_s12 }
   0x4   :  { %s2638_s15 = scalar_lea.hbm %s3100_s1, 64 }
   0x5   :  { %p2639_p0 = scmp.ne.s32.totalorder %s3100_s1, %s2638_s15  ;;  %p2642_p1 = scmp.lt.u32.totalorder %s2638_s15, %s3100_s1 }
   0x7   :  { %p2644_p2 = pnand %p2642_p1, %p2639_p0 }
   0x9   :  { %2647 = shalt.err (!%p2644_p2)
}
   0xa   :  { %s2648_s20 = scalar_lea.vmem %s26_s10, 64  ;;  %p2653_p4 = scmp.lt.s32.totalorder %s26_s10, %s26_s10 }
   0xb   :  { %p2649_p3 = scmp.ne.s32.totalorder %s26_s10, %s2648_s20  ;;  %p2654_p5 = scmp.lt.s32.totalorder %s2648_s20, %s2648_s20 }
   0xd   :  { %p2655_p6 = por %p2654_p5, %p2653_p4 }
   0xf   :  { %p2656_p7 = pnand %p2655_p6, %p2649_p3 }
  0x11   :  { %2659 = shalt.err (!%p2656_p7)
}
  0x12   :  { %28 = dma.hbm_to_vmem [thread:$0]  %s3100_s1, 64, %s26_s10, [#allocation3]  }
  0x13   :  { %s2660_s25 = scalar_lea.hbm %s3104_s5, 512 }
  0x14   :  { %p2661_p8 = scmp.ne.s32.totalorder %s3104_s5, %s2660_s25  ;;  %p2664_p9 = scmp.lt.u32.totalorder %s2660_s25, %s3104_s5 }
  0x16   :  { %p2666_p10 = pnand %p2664_p9, %p2661_p8 }
  0x18   :  { %2669 = shalt.err (!%p2666_p10)
}
  0x19   :  { %s2670_s30 = scalar_lea.vmem %s2770_s12, 512  ;;  %p2675_p12 = scmp.lt.s32.totalorder %s2770_s12, %s2770_s12 }
  0x1a   :  { %p2671_p11 = scmp.ne.s32.totalorder %s2770_s12, %s2670_s30  ;;  %p2676_p13 = scmp.lt.s32.totalorder %s2670_s30, %s2670_s30 }
  0x1c   :  { %p2677_p0 = por %p2676_p13, %p2675_p12 }
  0x1e   :  { %p2678_p1 = pnand %p2677_p0, %p2671_p11 }
  0x20   :  { %2681 = shalt.err (!%p2678_p1)
}
  0x21   :  { %s2712_s1 = smov 128   ;;  %s2713_s10 = smov 8  }
  0x22   :  { %46 = dma.hbm_to_vmem [thread:$0]  %s3104_s5, 512, %s2770_s12, [#allocation6], %s2712_s1, %s2712_s1, %s2713_s10  }
  0x23   :  { %2704 = dma.done.wait [#allocation3], 64  }
  0x24   :  { %2705 = vsyncadd [#allocation3], 4294967232 }
  0x25   :  { %2706 = dma.done.wait [#allocation6], 512  }
  0x26   :  { %2707 = vsyncadd [#allocation6], 4294966784  ;;  %v2714_v0 = vmov 0.0|0.0   ;;  %vm2715_vm0 = vmmov 0   ;;  %v2716_v1 = vmov 0.0   ;;  %vm76_vm1 = vcmask 1043456  }
  0x27   :  { %2422 = vmatprep.subr.bf16.mxu1 %v2714_v0  ;;  %2232 = vmatprep.mubr.msk.f32.mxu1 %vm2715_vm0, %v2716_v1  ;;  %vm69_vm2 = vcmask 31744   ;;  %v155_v2 = vld [vmem:[%s3101_s2] sm:$0xff]  ;;  %v156_v3 = vld [vmem:[%s3101_s2 + $0x8] sm:$0xff]  ;;  %v157_v8 = vld [vmem:[%s3101_s2 + $0x10] sm:$0xff]  ;;  %s2717_s24 = smov 64   ;;  %vm159_vm3 = vcmask 261120  }
  0x28   :  { %v61_v4 = vld [vmem:[#allocation2] sm:$0xf]  ;;  %v2810_v5 = vpack.c.bf16 %v156_v3, %v155_v2  ;;  %v59_v6 = vld [vmem:[%s3099_s0] sm:$0xff]  ;;  %v158_v9 = vld [vmem:[%s3101_s2 + $0x18] sm:$0xff]  ;;  %vm1010_vm4 = vcmask 1041408   ;;  %vm1013_vm5 = vcmask 1045504  }
  0x29   :  { %2219 = vmatprep.subr.msk.mxu0 %vm76_vm1, %v61_v4  ;;  %v60_v7 = vld [vmem:[%s3099_s0 + $0x8] sm:$0xff]  ;;  %2221 = vmatprep.mubr.msk.f32.mxu0 %vm69_vm2, %v59_v6  ;;  %v2827_v10 = vpack.c.bf16 %v158_v9, %v157_v8  ;;  %v2070_v11 = vld [vmem:[%s3102_s3] ss:$0 sm:$0xff]  ;;  %s2718_s3 = smov 32   ;;  %vm2052_vm6 = vcmask 58368  }
  0x2a   :  { %2220 = vmatpush3.msk.msra.mxu0 %vm76_vm1, %v61_v4  ;;  %2424 = vmatpush3.bf16.msra.mxu1 %v2810_v5 }
  0x2b   :  { %2222 = vmatmul.mubr.msk.f32.vlgmr.msra.gmra.mrb[0].mxu0 %vm69_vm2, %v60_v7  ;;  %2425 = vmatprep.subr.bf16.mxu1 %v2714_v0 }
  0x2c   :  { %2428 = vmatprep.subr.bf16.mxu0 %v2714_v0  ;;  %2243 = vmatprep.mubr.msk.f32.mxu0 %vm2715_vm0, %v2716_v1 }
  0x2d   :  { %2430 = vmatpush3.bf16.msra.mxu0 %v2810_v5 }
  0x2e   :  { %2431 = vmatprep.subr.bf16.mxu0 %v2714_v0  ;;  %2427 = vmatpush3.bf16.msra.mxu1 %v2827_v10 }
  0x2f   :  { %2434 = vmatprep.subr.bf16.mxu1 %v2714_v0 }
  0x31   :  { %2433 = vmatpush3.bf16.msra.mxu0 %v2827_v10  ;;  %2233 = vmatmul.mubr.f32.vlgmr.msra.gmra.mrb[0].mxu1 %v2716_v1 }
  0x32   :  { %2440 = vmatprep.subr.bf16.mxu0 %v2714_v0  ;;  %2436 = vmatpush3.bf16.msra.mxu1 %v2810_v5 }
  0x33   :  { %2254 = vmatprep.mubr.msk.f32.mxu1 %vm2715_vm0, %v2716_v1  ;;  %2437 = vmatprep.subr.bf16.mxu1 %v2714_v0 }
  0x36   :  { %2439 = vmatpush3.bf16.msra.mxu1 %v2827_v10 }
  0x37   :  { %2446 = vmatprep.subr.bf16.mxu1 %v2714_v0 }
  0xfe   :  { %v2223_v12 = vpop.f32.mrb[0].mxu0 }
  0xff   :  { %v2849_v13 = vadd.f32 %v2223_v12, %v2070_v11  ;;  %v146_v14 = vpop.f32.mrb[1].mxu0 }
 0x100   :  { %v2851_v15 = vadd.f32 %v2070_v11, %v146_v14 }
 0x104   :  { %v229_v16 = vpop.f32.mrb[0].mxu1 }
 0x105   :  { %v233_v17 = vadd.f32 %v229_v16, %v2851_v15  ;;  %v2234_v18 = vpop.f32.mrb[1].mxu1 }
 0x107   :  { %v2074_v19 = vmul.f32 -1.442695, %v233_v17 }
 0x109   :  { %2542 = vpow2.f32 %v2074_v19 }
 0x113   :  { %v2543_v20 = vpop.eup %2542 }
 0x114   :  { %v237_v21 = vadd.f32 1.0, %v2543_v20 }
 0x116   :  { %2544 = vrcp.f32 %v237_v21 }
 0x120   :  { %v2545_v22 = vpop.eup %2544 }
 0x121   :  { %v240_v23 = vmul.f32 2.0, %v2545_v22  ;;  %v242_v27 = vmul.f32 0.0, %v2545_v22 }
 0x123   :  { %v2075_v24 = vadd.f32 -1.0, %v240_v23 }
 0x125   :  { %244 = vrot.lane.b32.xlu0 %v2075_v24, %s2717_s24 }
 0x197   :  { %v245_v25 = vpop.permute.xlu0 %244 }
 0x198   :  { %v247_v26 = vmul.f32 %v2545_v22, %v245_v25 }
 0x19a   :  { %249 = vrot.lane.b32.xlu0 %v247_v26, %s2718_s3 }
 0x20c   :  { %v250_v28 = vpop.permute.xlu0 %249 }
 0x20d   :  { %v252_v29 = vadd.f32 %v250_v28, %v242_v27 }
 0x20f   :  { %2546 = vtanh.f32 %v252_v29  ;;  %v347_v46 = vrot.slane %v252_v29, 6 }
 0x219   :  { %v2547_v30 = vpop.eup %2546 }
 0x21a   :  { %255 = vrot.lane.b32.xlu1 %v2547_v30, %s2717_s24 }
 0x28c   :  { %v256_v31 = vpop.permute.xlu1 %255 }
 0x28d   :  { %v2857_v32 = vmul.f32 %v2545_v22, %v256_v31 }
 0x28f   :  { %260 = vrot.lane.b32.xlu1 %v2857_v32, %s2718_s3 }
 0x301   :  { %v261_v33 = vpop.permute.xlu1 %260 }
 0x302   :  { %2244 = vmatmul.mubr.msk.f32.vlgmr.msra.gmra.mrb[2].mxu0 %vm159_vm3, %v261_v33 }
 0x303   :  { %2442 = vmatpush3.bf16.msra.mxu0 %v2810_v5  ;;  %2265 = vmatprep.mubr.msk.f32.mxu0 %vm2715_vm0, %v2716_v1 }
 0x304   :  { %2443 = vmatprep.subr.bf16.mxu0 %v2714_v0 }
 0x307   :  { %2445 = vmatpush3.bf16.msra.mxu0 %v2827_v10 }
 0x308   :  { %2452 = vmatprep.subr.bf16.mxu0 %v2714_v0 }
 0x3d5   :  { %v330_v34 = vpop.f32.mrb[2].mxu0 }
 0x3d6   :  { %v335_v35 = vrot.slane %v330_v34, 6  ;;  %v2245_v36 = vpop.f32.mrb[3].mxu0 }
 0x3d8   :  { %v337_v37 = vadd.f32 %v335_v35, %v2851_v15 }
 0x3da   :  { %v2077_v38 = vmul.f32 -1.442695, %v337_v37 }
 0x3dc   :  { %2548 = vpow2.f32 %v2077_v38 }
 0x3e6   :  { %v2549_v39 = vpop.eup %2548 }
 0x3e7   :  { %v341_v40 = vadd.f32 1.0, %v2549_v39 }
 0x3e9   :  { %2550 = vrcp.f32 %v341_v40 }
 0x3f3   :  { %v2551_v41 = vpop.eup %2550 }
 0x3f4   :  { %v344_v42 = vmul.f32 2.0, %v2551_v41  ;;  %v349_v47 = vmul.f32 %v2551_v41, %v347_v46 }
 0x3f6   :  { %v2078_v43 = vadd.f32 -1.0, %v344_v42 }
 0x3f8   :  { %351 = vrot.lane.b32.xlu0 %v2078_v43, %s2717_s24 }
 0x46a   :  { %v352_v44 = vpop.permute.xlu0 %351 }
 0x46b   :  { %v354_v45 = vmul.f32 %v2551_v41, %v352_v44 }
 0x46d   :  { %356 = vrot.lane.b32.xlu1 %v354_v45, %s2718_s3 }
 0x4df   :  { %v357_v48 = vpop.permute.xlu1 %356 }
 0x4e0   :  { %v359_v49 = vadd.f32 %v357_v48, %v349_v47 }
 0x4e2   :  { %2552 = vtanh.f32 %v359_v49  ;;  %v455_v6 = vrot.slane %v359_v49, 6 }
 0x4ec   :  { %v2553_v50 = vpop.eup %2552 }
 0x4ed   :  { %362 = vrot.lane.b32.xlu0 %v2553_v50, %s2717_s24 }
 0x55f   :  { %v363_v51 = vpop.permute.xlu0 %362 }
 0x560   :  { %v365_v52 = vmul.f32 %v2551_v41, %v363_v51 }
 0x562   :  { %v367_v53 = vrot.slane %v365_v52, 2  ;;  %v1011_v16 = vsel %vm1010_vm4, %v2857_v32, %v365_v52 }
 0x564   :  { %368 = vrot.lane.b32.xlu1 %v367_v53, %s2718_s3 }
 0x5d6   :  { %v369_v54 = vpop.permute.xlu1 %368 }
 0x5d7   :  { %2255 = vmatmul.mubr.msk.f32.vlgmr.msra.gmra.mrb[2].mxu1 %vm159_vm3, %v369_v54 }
 0x5d8   :  { %2448 = vmatpush3.bf16.msra.mxu1 %v2810_v5  ;;  %2276 = vmatprep.mubr.msk.f32.mxu1 %vm2715_vm0, %v2716_v1 }
 0x5d9   :  { %2449 = vmatprep.subr.bf16.mxu1 %v2714_v0 }
 0x5dc   :  { %2451 = vmatpush3.bf16.msra.mxu1 %v2827_v10 }
 0x5dd   :  { %2458 = vmatprep.subr.bf16.mxu1 %v2714_v0 }
 0x6aa   :  { %v438_v55 = vpop.f32.mrb[2].mxu1 }
 0x6ab   :  { %v443_v56 = vrot.slane %v438_v55, 4  ;;  %v2256_v57 = vpop.f32.mrb[3].mxu1 }
 0x6ad   :  { %v445_v58 = vadd.f32 %v443_v56, %v2851_v15 }
 0x6af   :  { %v2080_v59 = vmul.f32 -1.442695, %v445_v58 }
 0x6b1   :  { %2554 = vpow2.f32 %v2080_v59 }
 0x6bb   :  { %v2555_v60 = vpop.eup %2554 }
 0x6bc   :  { %v449_v61 = vadd.f32 1.0, %v2555_v60 }
 0x6be   :  { %2556 = vrcp.f32 %v449_v61 }
 0x6c8   :  { %v2557_v62 = vpop.eup %2556 }
 0x6c9   :  { %v452_v63 = vmul.f32 2.0, %v2557_v62  ;;  %v457_v7 = vmul.f32 %v2557_v62, %v455_v6 }
 0x6cb   :  { %v2081_v2 = vadd.f32 -1.0, %v452_v63 }
 0x6cd   :  { %459 = vrot.lane.b32.xlu0 %v2081_v2, %s2717_s24 }
 0x73f   :  { %v460_v3 = vpop.permute.xlu0 %459 }
 0x740   :  { %v462_v4 = vmul.f32 %v2557_v62, %v460_v3 }
 0x742   :  { %464 = vrot.lane.b32.xlu1 %v462_v4, %s2718_s3 }
 0x7b4   :  { %v465_v8 = vpop.permute.xlu1 %464 }
 0x7b5   :  { %v467_v9 = vadd.f32 %v465_v8, %v457_v7 }
 0x7b7   :  { %2558 = vtanh.f32 %v467_v9  ;;  %v563_v32 = vrot.slane %v467_v9, 6 }
 0x7c1   :  { %v2559_v11 = vpop.eup %2558 }
 0x7c2   :  { %470 = vrot.lane.b32.xlu0 %v2559_v11, %s2717_s24 }
 0x834   :  { %v471_v12 = vpop.permute.xlu0 %470 }
 0x835   :  { %v473_v14 = vmul.f32 %v2557_v62, %v471_v12 }
 0x837   :  { %v475_v17 = vrot.slane %v473_v14, 4  ;;  %v1012_v18 = vsel %vm76_vm1, %v1011_v16, %v473_v14 }
 0x839   :  { %476 = vrot.lane.b32.xlu1 %v475_v17, %s2718_s3 }
 0x8ab   :  { %v477_v19 = vpop.permute.xlu1 %476 }
 0x8ac   :  { %2266 = vmatmul.mubr.msk.f32.vlgmr.msra.gmra.mrb[4].mxu0 %vm159_vm3, %v477_v19 }
 0x8ad   :  { %2454 = vmatpush3.bf16.msra.mxu0 %v2810_v5  ;;  %2287 = vmatprep.mubr.msk.f32.mxu0 %vm2715_vm0, %v2716_v1 }
 0x8ae   :  { %2455 = vmatprep.subr.bf16.mxu0 %v2714_v0 }
 0x8b1   :  { %2457 = vmatpush3.bf16.msra.mxu0 %v2827_v10 }
 0x8b2   :  { %2464 = vmatprep.subr.bf16.mxu0 %v2714_v0 }
 0x97f   :  { %v546_v20 = vpop.f32.mrb[4].mxu0 }
 0x980   :  { %v551_v21 = vrot.slane %v546_v20, 2  ;;  %v2267_v22 = vpop.f32.mrb[5].mxu0 }
 0x982   :  { %v553_v23 = vadd.f32 %v551_v21, %v2851_v15 }
 0x984   :  { %v2083_v24 = vmul.f32 -1.442695, %v553_v23 }
 0x986   :  { %2560 = vpow2.f32 %v2083_v24 }
 0x990   :  { %v2561_v25 = vpop.eup %2560 }
 0x991   :  { %v557_v26 = vadd.f32 1.0, %v2561_v25 }
 0x993   :  { %2562 = vrcp.f32 %v557_v26 }
 0x99d   :  { %v2563_v27 = vpop.eup %2562 }
 0x99e   :  { %v560_v28 = vmul.f32 2.0, %v2563_v27  ;;  %v565_v33 = vmul.f32 %v2563_v27, %v563_v32 }
 0x9a0   :  { %v2084_v29 = vadd.f32 -1.0, %v560_v28 }
 0x9a2   :  { %567 = vrot.lane.b32.xlu0 %v2084_v29, %s2717_s24 }
 0xa14   :  { %v568_v30 = vpop.permute.xlu0 %567 }
 0xa15   :  { %v570_v31 = vmul.f32 %v2563_v27, %v568_v30 }
 0xa17   :  { %572 = vrot.lane.b32.xlu1 %v570_v31, %s2718_s3 }
 0xa89   :  { %v573_v34 = vpop.permute.xlu1 %572 }
 0xa8a   :  { %v575_v35 = vadd.f32 %v573_v34, %v565_v33 }
 0xa8c   :  { %2564 = vtanh.f32 %v575_v35  ;;  %v668_v52 = vrot.slane %v575_v35, 6 }
 0xa96   :  { %v2565_v15 = vpop.eup %2564 }
 0xa97   :  { %578 = vrot.lane.b32.xlu0 %v2565_v15, %s2717_s24 }
 0xb09   :  { %v579_v36 = vpop.permute.xlu0 %578 }
 0xb0a   :  { %v581_v37 = vmul.f32 %v2563_v27, %v579_v36 }
 0xb0c   :  { %v583_v38 = vrot.slane %v581_v37, 6  ;;  %v2900_v39 = vsel %vm1013_vm5, %v1012_v18, %v581_v37 }
 0xb0e   :  { %584 = vrot.lane.b32.xlu1 %v583_v38, %s2718_s3 }
 0xb80   :  { %v585_v40 = vpop.permute.xlu1 %584 }
 0xb81   :  { %2277 = vmatmul.mubr.msk.f32.vlgmr.msra.gmra.mrb[4].mxu1 %vm159_vm3, %v585_v40 }
 0xb82   :  { %2460 = vmatpush3.bf16.msra.mxu1 %v2810_v5  ;;  %2298 = vmatprep.mubr.msk.f32.mxu1 %vm2715_vm0, %v2716_v1 }
 0xb83   :  { %2461 = vmatprep.subr.bf16.mxu1 %v2714_v0 }
 0xb86   :  { %2463 = vmatpush3.bf16.msra.mxu1 %v2827_v10 }
 0xc54   :  { %v654_v41 = vpop.f32.mrb[4].mxu1 }
 0xc55   :  { %v658_v42 = vadd.f32 %v654_v41, %v2849_v13  ;;  %v2278_v43 = vpop.f32.mrb[5].mxu1 }
 0xc57   :  { %v2086_v44 = vmul.f32 -1.442695, %v658_v42 }
 0xc59   :  { %2566 = vpow2.f32 %v2086_v44 }
 0xc63   :  { %v2567_v45 = vpop.eup %2566 }
 0xc64   :  { %v662_v46 = vadd.f32 1.0, %v2567_v45 }
 0xc66   :  { %2568 = vrcp.f32 %v662_v46 }
 0xc70   :  { %v2569_v47 = vpop.eup %2568 }
 0xc71   :  { %v665_v48 = vmul.f32 2.0, %v2569_v47  ;;  %v670_v53 = vmul.f32 %v2569_v47, %v668_v52 }
 0xc73   :  { %v2087_v49 = vadd.f32 -1.0, %v665_v48 }
 0xc75   :  { %672 = vrot.lane.b32.xlu0 %v2087_v49, %s2717_s24 }
 0xce7   :  { %v673_v50 = vpop.permute.xlu0 %672 }
 0xce8   :  { %v675_v51 = vmul.f32 %v2569_v47, %v673_v50 }
 0xcea   :  { %677 = vrot.lane.b32.xlu1 %v675_v51, %s2718_s3 }
 0xd5c   :  { %v678_v54 = vpop.permute.xlu1 %677 }
 0xd5d   :  { %v680_v55 = vadd.f32 %v678_v54, %v670_v53 }
 0xd5f   :  { %2570 = vtanh.f32 %v680_v55 }
 0xd69   :  { %v2571_v56 = vpop.eup %2570 }
 0xd6a   :  { %683 = vrot.lane.b32.xlu0 %v2571_v56, %s2717_s24 }
 0xddc   :  { %v684_v57 = vpop.permute.xlu0 %683 }
 0xddd   :  { %v2913_v58 = vmul.f32 %v2569_v47, %v684_v57 }
 0xddf   :  { %688 = vrot.lane.b32.xlu1 %v2913_v58, %s2718_s3 }
 0xe51   :  { %v689_v59 = vpop.permute.xlu1 %688 }
 0xe52   :  { %2288 = vmatmul.mubr.msk.f32.vlgmr.msra.gmra.mrb[6].mxu0 %vm159_vm3, %v689_v59 }
 0xe53   :  { %2466 = vmatpush3.bf16.msra.mxu0 %v2810_v5  ;;  %2309 = vmatprep.mubr.msk.f32.mxu0 %vm2715_vm0, %v2716_v1 }
 0xe54   :  { %2467 = vmatprep.subr.bf16.mxu0 %v2714_v0 }
 0xe57   :  { %2469 = vmatpush3.bf16.msra.mxu0 %v2827_v10  ;;  %v775_v10 = vrot.slane %v680_v55, 6 }
 0xe58   :  { %2478 = vmatprep.subr.bf16.mxu0 %v2714_v0 }
 0xf25   :  { %v758_v60 = vpop.f32.mrb[6].mxu0 }
 0xf26   :  { %v763_v61 = vrot.slane %v758_v60, 6  ;;  %v2289_v62 = vpop.f32.mrb[7].mxu0  ;;  %v1018_v60 = vld [vmem:[%s3103_s4] sm:$0xff] }
 0xf27   :  { %v1114_v62 = vld [vmem:[#allocation5] sm:$0xff] }
 0xf28   :  { %v765_v63 = vadd.f32 %v763_v61, %v2849_v13  ;;  %v1019_v61 = vld [vmem:[%s3103_s4 + $0x8] sm:$0xff] }
 0xf2a   :  { %v2089_v2 = vmul.f32 -1.442695, %v765_v63  ;;  %v2470_v63 = vpack.c.bf16 %v1019_v61, %v1018_v60 }
 0xf2c   :  { %2572 = vpow2.f32 %v2089_v2  ;;  %v1115_v2 = vld [vmem:[#allocation5 + $0x8] sm:$0xff]  ;;  %2471 = vmatprep.subr.bf16.mxu1 %v2470_v63 }
 0xf36   :  { %v2573_v3 = vpop.eup %2572 }
 0xf37   :  { %v769_v4 = vadd.f32 1.0, %v2573_v3  ;;  %v1021_v3 = vld [vmem:[%s3103_s4 + $0x18] sm:$0xff] }
 0xf39   :  { %2574 = vrcp.f32 %v769_v4  ;;  %v2959_v4 = vpack.c.bf16 %v1115_v2, %v1114_v62 }
 0xf43   :  { %v2575_v5 = vpop.eup %2574 }
 0xf44   :  { %v772_v6 = vmul.f32 2.0, %v2575_v5  ;;  %v777_v11 = vmul.f32 %v2575_v5, %v775_v10 }
 0xf46   :  { %v2090_v7 = vadd.f32 -1.0, %v772_v6  ;;  %v1116_v6 = vld [vmem:[#allocation5 + $0x10] sm:$0xff] }
 0xf48   :  { %779 = vrot.lane.b32.xlu0 %v2090_v7, %s2717_s24  ;;  %v1117_v7 = vld [vmem:[#allocation5 + $0x18] sm:$0xff] }
 0xfba   :  { %v780_v8 = vpop.permute.xlu0 %779 }
 0xfbb   :  { %v782_v9 = vmul.f32 %v2575_v5, %v780_v8  ;;  %v2962_v8 = vpack.c.bf16 %v1117_v7, %v1116_v6 }
 0xfbd   :  { %784 = vrot.lane.b32.xlu1 %v782_v9, %s2718_s3 }
0x102f   :  { %v785_v12 = vpop.permute.xlu1 %784 }
0x1030   :  { %v787_v14 = vadd.f32 %v785_v12, %v777_v11 }
0x1032   :  { %2576 = vtanh.f32 %v787_v14  ;;  %v883_v33 = vrot.slane %v787_v14, 6 }
0x103c   :  { %v2577_v16 = vpop.eup %2576 }
0x103d   :  { %790 = vrot.lane.b32.xlu0 %v2577_v16, %s2717_s24 }
0x10af   :  { %v791_v17 = vpop.permute.xlu0 %790 }
0x10b0   :  { %v793_v18 = vmul.f32 %v2575_v5, %v791_v17 }
0x10b2   :  { %v795_v19 = vrot.slane %v793_v18, 2  ;;  %v1015_v40 = vsel %vm1010_vm4, %v2913_v58, %v793_v18  ;;  %v2097_v18 = vld [vmem:[%s3105_s6] ss:$0 sm:$0xff] }
0x10b4   :  { %796 = vrot.lane.b32.xlu1 %v795_v19, %s2718_s3 }
0x1126   :  { %v797_v20 = vpop.permute.xlu1 %796 }
0x1127   :  { %2299 = vmatmul.mubr.msk.f32.vlgmr.msra.gmra.mrb[6].mxu1 %vm159_vm3, %v797_v20 }
0x1128   :  { %2473 = vmatpush3.bf16.msra.mxu1 %v2470_v63 }
0x11fa   :  { %v866_v21 = vpop.f32.mrb[6].mxu1 }
0x11fb   :  { %v871_v22 = vrot.slane %v866_v21, 4  ;;  %v2300_v23 = vpop.f32.mrb[7].mxu1 }
0x11fd   :  { %v873_v24 = vadd.f32 %v871_v22, %v2849_v13 }
0x11ff   :  { %v2092_v25 = vmul.f32 -1.442695, %v873_v24 }
0x1201   :  { %2578 = vpow2.f32 %v2092_v25 }
0x120b   :  { %v2579_v26 = vpop.eup %2578 }
0x120c   :  { %v877_v27 = vadd.f32 1.0, %v2579_v26 }
0x120e   :  { %2580 = vrcp.f32 %v877_v27 }
0x1218   :  { %v2581_v28 = vpop.eup %2580 }
0x1219   :  { %v880_v29 = vmul.f32 2.0, %v2581_v28  ;;  %v885_v34 = vmul.f32 %v2581_v28, %v883_v33 }
0x121b   :  { %v2093_v30 = vadd.f32 -1.0, %v880_v29 }
0x121d   :  { %887 = vrot.lane.b32.xlu0 %v2093_v30, %s2717_s24 }
0x128f   :  { %v888_v31 = vpop.permute.xlu0 %887 }
0x1290   :  { %v890_v32 = vmul.f32 %v2581_v28, %v888_v31 }
0x1292   :  { %892 = vrot.lane.b32.xlu1 %v890_v32, %s2718_s3 }
0x1304   :  { %v893_v35 = vpop.permute.xlu1 %892 }
0x1305   :  { %v895_v15 = vadd.f32 %v893_v35, %v885_v34 }
0x1307   :  { %2582 = vtanh.f32 %v895_v15  ;;  %v991_v56 = vrot.slane %v895_v15, 6 }
0x1311   :  { %v2583_v36 = vpop.eup %2582 }
0x1312   :  { %898 = vrot.lane.b32.xlu0 %v2583_v36, %s2717_s24 }
0x1384   :  { %v899_v37 = vpop.permute.xlu0 %898 }
0x1385   :  { %v901_v38 = vmul.f32 %v2581_v28, %v899_v37 }
0x1387   :  { %v903_v41 = vrot.slane %v901_v38, 4  ;;  %v1016_v42 = vsel %vm76_vm1, %v1015_v40, %v901_v38 }
0x1389   :  { %904 = vrot.lane.b32.xlu1 %v903_v41, %s2718_s3 }
0x13fb   :  { %v905_v43 = vpop.permute.xlu1 %904 }
0x13fc   :  { %2310 = vmatmul.mubr.msk.f32.vlgmr.msra.gmra.mrb[8].mxu0 %vm159_vm3, %v905_v43 }
0x13fd   :  { %2331 = vmatprep.mubr.msk.f32.mxu0 %vm2715_vm0, %v2716_v1  ;;  %2480 = vmatpush3.bf16.msra.mxu0 %v2959_v4 }
0x13fe   :  { %2481 = vmatprep.subr.bf16.mxu0 %v2714_v0 }
0x1401   :  { %2483 = vmatpush3.bf16.msra.mxu0 %v2962_v8 }
0x1402   :  { %2490 = vmatprep.subr.bf16.mxu0 %v2714_v0 }
0x1404   :  { %2332 = vmatmul.mubr.f32.vlgmr.msra.gmra.mrb[10].mxu0 %v2716_v1 }
0x1405   :  { %2492 = vmatpush3.bf16.msra.mxu0 %v2959_v4  ;;  %2353 = vmatprep.mubr.msk.f32.mxu0 %vm2715_vm0, %v2716_v1 }
0x1406   :  { %2493 = vmatprep.subr.bf16.mxu0 %v2714_v0 }
0x1409   :  { %2495 = vmatpush3.bf16.msra.mxu0 %v2962_v8 }
0x140a   :  { %2502 = vmatprep.subr.bf16.mxu0 %v2714_v0 }
0x14cf   :  { %v974_v44 = vpop.f32.mrb[8].mxu0 }
0x14d0   :  { %v979_v45 = vrot.slane %v974_v44, 2  ;;  %v2311_v46 = vpop.f32.mrb[9].mxu0 }
0x14d2   :  { %v981_v47 = vadd.f32 %v979_v45, %v2849_v13 }
0x14d4   :  { %v2095_v48 = vmul.f32 -1.442695, %v981_v47 }
0x14d6   :  { %2584 = vpow2.f32 %v2095_v48 }
0x14d7   :  { %v1184_v16 = vpop.f32.mrb[10].mxu0 }
0x14d8   :  { %v2333_v17 = vpop.f32.mrb[11].mxu0 }
0x14e0   :  { %v2585_v49 = vpop.eup %2584 }
0x14e1   :  { %v985_v50 = vadd.f32 1.0, %v2585_v49 }
0x14e3   :  { %2586 = vrcp.f32 %v985_v50 }
0x14ed   :  { %v2587_v51 = vpop.eup %2586 }
0x14ee   :  { %v988_v52 = vmul.f32 2.0, %v2587_v51  ;;  %v993_v57 = vmul.f32 %v2587_v51, %v991_v56 }
0x14f0   :  { %v2096_v53 = vadd.f32 -1.0, %v988_v52 }
0x14f2   :  { %995 = vrot.lane.b32.xlu0 %v2096_v53, %s2717_s24 }
0x1564   :  { %v996_v54 = vpop.permute.xlu0 %995 }
0x1565   :  { %v998_v55 = vmul.f32 %v2587_v51, %v996_v54 }
0x1567   :  { %1000 = vrot.lane.b32.xlu1 %v998_v55, %s2718_s3 }
0x156b   :  { %1031 = vrot.lane.b32.xlu1 %v2900_v39, %s2718_s3  ;;  %v1020_v39 = vld [vmem:[%s3103_s4 + $0x10] sm:$0xff] }
0x156c   :  { %v2474_v5 = vpack.c.bf16 %v1021_v3, %v1020_v39 }
0x156e   :  { %2475 = vmatprep.subr.bf16.mxu1 %v2474_v5 }
0x156f   :  { %2477 = vmatpush3.bf16.msra.mxu1 %v2474_v5 }
0x1570   :  { %2484 = vmatprep.subr.bf16.mxu1 %v2714_v0 }
0x15d9   :  { %v1001_v13 = vpop.permute.xlu1 %1000 }
0x15da   :  { %v1003_v58 = vadd.f32 %v1001_v13, %v993_v57 }
0x15dc   :  { %2588 = vtanh.f32 %v1003_v58 }
0x15dd   :  { %v1032_v59 = vpop.permute.xlu1 %1031 }
0x15de   :  { %2320 = vmatprep.mubr.msk.f32.mxu1 %vm159_vm3, %v1032_v59 }
0x15e6   :  { %v2589_v9 = vpop.eup %2588 }
0x15e7   :  { %1006 = vrot.lane.b32.xlu0 %v2589_v9, %s2717_s24 }
0x1659   :  { %v1007_v10 = vpop.permute.xlu0 %1006 }
0x165a   :  { %v1009_v11 = vmul.f32 %v2587_v51, %v1007_v10 }
0x165c   :  { %v1017_v12 = vsel %vm1013_vm5, %v1016_v42, %v1009_v11 }
0x165d   :  { %1033 = vrot.lane.b32.xlu0 %v1017_v12, %s2718_s3 }
0x16cf   :  { %v1034_v14 = vpop.permute.xlu0 %1033 }
0x16d0   :  { %2321 = vmatmul.mubr.msk.f32.vlgmr.msra.gmra.mrb[8].mxu1 %vm159_vm3, %v1034_v14 }
0x16d1   :  { %2486 = vmatpush3.bf16.msra.mxu1 %v2959_v4  ;;  %2342 = vmatprep.mubr.msk.f32.mxu1 %vm2715_vm0, %v2716_v1 }
0x16d2   :  { %2487 = vmatprep.subr.bf16.mxu1 %v2714_v0 }
0x16d5   :  { %2489 = vmatpush3.bf16.msra.mxu1 %v2962_v8 }
0x16d6   :  { %2496 = vmatprep.subr.bf16.mxu1 %v2714_v0 }
0x17a3   :  { %v2322_v19 = vpop.f32.mrb[8].mxu1 }
0x17a4   :  { %v2988_v20 = vadd.f32 %v2322_v19, %v2097_v18  ;;  %v1105_v21 = vpop.f32.mrb[9].mxu1 }
0x17a5   :  { %v2990_v22 = vadd.f32 %v2097_v18, %v1105_v21 }
0x17a7   :  { %v1188_v23 = vadd.f32 %v1184_v16, %v2990_v22 }
0x17a9   :  { %v2100_v24 = vmul.f32 -1.442695, %v1188_v23 }
0x17ab   :  { %2590 = vpow2.f32 %v2100_v24 }
0x17b5   :  { %v2591_v25 = vpop.eup %2590 }
0x17b6   :  { %v1192_v26 = vadd.f32 1.0, %v2591_v25 }
0x17b8   :  { %2592 = vrcp.f32 %v1192_v26 }
0x17c2   :  { %v2593_v27 = vpop.eup %2592 }
0x17c3   :  { %v1195_v28 = vmul.f32 2.0, %v2593_v27  ;;  %v1197_v32 = vmul.f32 0.0, %v2593_v27 }
0x17c5   :  { %v2101_v29 = vadd.f32 -1.0, %v1195_v28 }
0x17c7   :  { %1199 = vrot.lane.b32.xlu1 %v2101_v29, %s2717_s24 }
0x1839   :  { %v1200_v30 = vpop.permute.xlu1 %1199 }
0x183a   :  { %v1202_v31 = vmul.f32 %v2593_v27, %v1200_v30 }
0x183c   :  { %1204 = vrot.lane.b32.xlu0 %v1202_v31, %s2718_s3 }
0x18ae   :  { %v1205_v33 = vpop.permute.xlu0 %1204 }
0x18af   :  { %v1207_v34 = vadd.f32 %v1205_v33, %v1197_v32 }
0x18b1   :  { %2594 = vtanh.f32 %v1207_v34  ;;  %v1302_v51 = vrot.slane %v1207_v34, 6 }
0x18bb   :  { %v2595_v35 = vpop.eup %2594 }
0x18bc   :  { %1210 = vrot.lane.b32.xlu1 %v2595_v35, %s2717_s24 }
0x192e   :  { %v1211_v15 = vpop.permute.xlu1 %1210 }
0x192f   :  { %v1213_v36 = vmul.f32 %v2593_v27, %v1211_v15 }
0x1931   :  { %1215 = vrot.lane.b32.xlu0 %v1213_v36, %s2718_s3 }
0x19a3   :  { %v1216_v37 = vpop.permute.xlu0 %1215 }
0x19a4   :  { %2343 = vmatmul.mubr.msk.f32.vlgmr.msra.gmra.mrb[10].mxu1 %vm159_vm3, %v1216_v37 }
0x19a5   :  { %2498 = vmatpush3.bf16.msra.mxu1 %v2959_v4  ;;  %2364 = vmatprep.mubr.msk.f32.mxu1 %vm2715_vm0, %v2716_v1 }
0x19a6   :  { %2499 = vmatprep.subr.bf16.mxu1 %v2714_v0 }
0x19a9   :  { %2501 = vmatpush3.bf16.msra.mxu1 %v2962_v8 }
0x19aa   :  { %2508 = vmatprep.subr.bf16.mxu1 %v2714_v0 }
0x1a77   :  { %v1285_v38 = vpop.f32.mrb[10].mxu1 }
0x1a78   :  { %v1290_v40 = vrot.slane %v1285_v38, 6  ;;  %v2344_v41 = vpop.f32.mrb[11].mxu1 }
0x1a7a   :  { %v1292_v42 = vadd.f32 %v1290_v40, %v2990_v22 }
0x1a7c   :  { %v2103_v43 = vmul.f32 -1.442695, %v1292_v42 }
0x1a7e   :  { %2596 = vpow2.f32 %v2103_v43 }
0x1a88   :  { %v2597_v44 = vpop.eup %2596 }
0x1a89   :  { %v1296_v45 = vadd.f32 1.0, %v2597_v44 }
0x1a8b   :  { %2598 = vrcp.f32 %v1296_v45 }
0x1a95   :  { %v2599_v46 = vpop.eup %2598 }
0x1a96   :  { %v1299_v47 = vmul.f32 2.0, %v2599_v46  ;;  %v1304_v52 = vmul.f32 %v2599_v46, %v1302_v51 }
0x1a98   :  { %v2104_v48 = vadd.f32 -1.0, %v1299_v47 }
0x1a9a   :  { %1306 = vrot.lane.b32.xlu1 %v2104_v48, %s2717_s24 }
0x1b0c   :  { %v1307_v49 = vpop.permute.xlu1 %1306 }
0x1b0d   :  { %v1309_v50 = vmul.f32 %v2599_v46, %v1307_v49 }
0x1b0f   :  { %1311 = vrot.lane.b32.xlu0 %v1309_v50, %s2718_s3 }
0x1b81   :  { %v1312_v53 = vpop.permute.xlu0 %1311 }
0x1b82   :  { %v1314_v54 = vadd.f32 %v1312_v53, %v1304_v52 }
0x1b84   :  { %2600 = vtanh.f32 %v1314_v54  ;;  %v1410_v10 = vrot.slane %v1314_v54, 6 }
0x1b8e   :  { %v2601_v55 = vpop.eup %2600 }
0x1b8f   :  { %1317 = vrot.lane.b32.xlu1 %v2601_v55, %s2717_s24 }
0x1c01   :  { %v1318_v56 = vpop.permute.xlu1 %1317 }
0x1c02   :  { %v1320_v57 = vmul.f32 %v2599_v46, %v1318_v56 }
0x1c04   :  { %v1322_v13 = vrot.slane %v1320_v57, 2 }
0x1c06   :  { %1323 = vrot.lane.b32.xlu0 %v1322_v13, %s2718_s3 }
0x1c78   :  { %v1324_v58 = vpop.permute.xlu0 %1323 }
0x1c79   :  { %2354 = vmatmul.mubr.msk.f32.vlgmr.msra.gmra.mrb[12].mxu0 %vm159_vm3, %v1324_v58 }
0x1c7a   :  { %2504 = vmatpush3.bf16.msra.mxu0 %v2959_v4  ;;  %2375 = vmatprep.mubr.msk.f32.mxu0 %vm2715_vm0, %v2716_v1 }
0x1c7b   :  { %2505 = vmatprep.subr.bf16.mxu0 %v2714_v0 }
0x1c7e   :  { %2507 = vmatpush3.bf16.msra.mxu0 %v2962_v8 }
0x1c7f   :  { %2514 = vmatprep.subr.bf16.mxu0 %v2714_v0 }
0x1d4c   :  { %v1393_v59 = vpop.f32.mrb[12].mxu0 }
0x1d4d   :  { %v1398_v60 = vrot.slane %v1393_v59, 4  ;;  %v2355_v61 = vpop.f32.mrb[13].mxu0 }
0x1d4f   :  { %v1400_v62 = vadd.f32 %v1398_v60, %v2990_v22 }
0x1d51   :  { %v2106_v63 = vmul.f32 -1.442695, %v1400_v62 }
0x1d53   :  { %2602 = vpow2.f32 %v2106_v63 }
0x1d5d   :  { %v2603_v2 = vpop.eup %2602 }
0x1d5e   :  { %v1404_v39 = vadd.f32 1.0, %v2603_v2 }
0x1d60   :  { %2604 = vrcp.f32 %v1404_v39 }
0x1d6a   :  { %v2605_v3 = vpop.eup %2604 }
0x1d6b   :  { %v1407_v5 = vmul.f32 2.0, %v2605_v3  ;;  %v1412_v11 = vmul.f32 %v2605_v3, %v1410_v10 }
0x1d6d   :  { %v2107_v6 = vadd.f32 -1.0, %v1407_v5 }
0x1d6f   :  { %1414 = vrot.lane.b32.xlu1 %v2107_v6, %s2717_s24 }
0x1de1   :  { %v1415_v7 = vpop.permute.xlu1 %1414 }
0x1de2   :  { %v1417_v9 = vmul.f32 %v2605_v3, %v1415_v7 }
0x1de4   :  { %1419 = vrot.lane.b32.xlu0 %v1417_v9, %s2718_s3 }
0x1e56   :  { %v1420_v12 = vpop.permute.xlu0 %1419 }
0x1e57   :  { %v1422_v14 = vadd.f32 %v1420_v12, %v1412_v11 }
0x1e59   :  { %2606 = vtanh.f32 %v1422_v14  ;;  %v1518_v35 = vrot.slane %v1422_v14, 6 }
0x1e63   :  { %v2607_v16 = vpop.eup %2606 }
0x1e64   :  { %1425 = vrot.lane.b32.xlu1 %v2607_v16, %s2717_s24 }
0x1ed6   :  { %v1426_v17 = vpop.permute.xlu1 %1425 }
0x1ed7   :  { %v1428_v18 = vmul.f32 %v2605_v3, %v1426_v17 }
0x1ed9   :  { %v1430_v19 = vrot.slane %v1428_v18, 4 }
0x1edb   :  { %1431 = vrot.lane.b32.xlu0 %v1430_v19, %s2718_s3 }
0x1f4d   :  { %v1432_v21 = vpop.permute.xlu0 %1431 }
0x1f4e   :  { %2365 = vmatmul.mubr.msk.f32.vlgmr.msra.gmra.mrb[12].mxu1 %vm159_vm3, %v1432_v21 }
0x1f4f   :  { %2510 = vmatpush3.bf16.msra.mxu1 %v2959_v4  ;;  %2386 = vmatprep.mubr.msk.f32.mxu1 %vm2715_vm0, %v2716_v1 }
0x1f50   :  { %2511 = vmatprep.subr.bf16.mxu1 %v2714_v0 }
0x1f53   :  { %2513 = vmatpush3.bf16.msra.mxu1 %v2962_v8 }
0x1f54   :  { %2520 = vmatprep.subr.bf16.mxu1 %v2714_v0 }
0x2021   :  { %v1501_v23 = vpop.f32.mrb[12].mxu1 }
0x2022   :  { %v1506_v24 = vrot.slane %v1501_v23, 2  ;;  %v2366_v25 = vpop.f32.mrb[13].mxu1 }
0x2024   :  { %v1508_v26 = vadd.f32 %v1506_v24, %v2990_v22 }
0x2026   :  { %v2109_v27 = vmul.f32 -1.442695, %v1508_v26 }
0x2028   :  { %2608 = vpow2.f32 %v2109_v27 }
0x2032   :  { %v2609_v28 = vpop.eup %2608 }
0x2033   :  { %v1512_v29 = vadd.f32 1.0, %v2609_v28 }
0x2035   :  { %2610 = vrcp.f32 %v1512_v29 }
0x203f   :  { %v2611_v30 = vpop.eup %2610 }
0x2040   :  { %v1515_v31 = vmul.f32 2.0, %v2611_v30  ;;  %v1520_v15 = vmul.f32 %v2611_v30, %v1518_v35 }
0x2042   :  { %v2110_v32 = vadd.f32 -1.0, %v1515_v31 }
0x2044   :  { %1522 = vrot.lane.b32.xlu1 %v2110_v32, %s2717_s24 }
0x20b6   :  { %v1523_v33 = vpop.permute.xlu1 %1522 }
0x20b7   :  { %v1525_v34 = vmul.f32 %v2611_v30, %v1523_v33 }
0x20b9   :  { %1527 = vrot.lane.b32.xlu0 %v1525_v34, %s2718_s3 }
0x212b   :  { %v1528_v36 = vpop.permute.xlu0 %1527 }
0x212c   :  { %v1530_v37 = vadd.f32 %v1528_v36, %v1520_v15 }
0x212e   :  { %2612 = vtanh.f32 %v1530_v37  ;;  %v1623_v54 = vrot.slane %v1530_v37, 6 }
0x2138   :  { %v2613_v22 = vpop.eup %2612 }
0x2139   :  { %1533 = vrot.lane.b32.xlu1 %v2613_v22, %s2717_s24 }
0x21ab   :  { %v1534_v38 = vpop.permute.xlu1 %1533 }
0x21ac   :  { %v1536_v40 = vmul.f32 %v2611_v30, %v1534_v38 }
0x21ae   :  { %v1538_v41 = vrot.slane %v1536_v40, 6 }
0x21b0   :  { %1539 = vrot.lane.b32.xlu0 %v1538_v41, %s2718_s3 }
0x2222   :  { %v1540_v42 = vpop.permute.xlu0 %1539 }
0x2223   :  { %2376 = vmatmul.mubr.msk.f32.vlgmr.msra.gmra.mrb[14].mxu0 %vm159_vm3, %v1540_v42 }
0x2224   :  { %2516 = vmatpush3.bf16.msra.mxu0 %v2959_v4  ;;  %2397 = vmatprep.mubr.msk.f32.mxu0 %vm2715_vm0, %v2716_v1 }
0x2225   :  { %2517 = vmatprep.subr.bf16.mxu0 %v2714_v0 }
0x2228   :  { %2519 = vmatpush3.bf16.msra.mxu0 %v2962_v8 }
0x2229   :  { %2526 = vmatprep.subr.bf16.mxu0 %v2714_v0 }
0x22f6   :  { %v1609_v43 = vpop.f32.mrb[14].mxu0 }
0x22f7   :  { %v1613_v44 = vadd.f32 %v1609_v43, %v2988_v20  ;;  %v2377_v45 = vpop.f32.mrb[15].mxu0 }
0x22f9   :  { %v2112_v46 = vmul.f32 -1.442695, %v1613_v44 }
0x22fb   :  { %2614 = vpow2.f32 %v2112_v46 }
0x2305   :  { %v2615_v47 = vpop.eup %2614 }
0x2306   :  { %v1617_v48 = vadd.f32 1.0, %v2615_v47 }
0x2308   :  { %2616 = vrcp.f32 %v1617_v48 }
0x2312   :  { %v2617_v49 = vpop.eup %2616 }
0x2313   :  { %v1620_v50 = vmul.f32 2.0, %v2617_v49  ;;  %v1625_v55 = vmul.f32 %v2617_v49, %v1623_v54 }
0x2315   :  { %v2113_v51 = vadd.f32 -1.0, %v1620_v50 }
0x2317   :  { %1627 = vrot.lane.b32.xlu1 %v2113_v51, %s2717_s24 }
0x2389   :  { %v1628_v52 = vpop.permute.xlu1 %1627 }
0x238a   :  { %v1630_v53 = vmul.f32 %v2617_v49, %v1628_v52 }
0x238c   :  { %1632 = vrot.lane.b32.xlu0 %v1630_v53, %s2718_s3 }
0x23fe   :  { %v1633_v56 = vpop.permute.xlu0 %1632 }
0x23ff   :  { %v1635_v57 = vadd.f32 %v1633_v56, %v1625_v55 }
0x2401   :  { %2618 = vtanh.f32 %v1635_v57 }
0x240b   :  { %v2619_v13 = vpop.eup %2618 }
0x240c   :  { %1638 = vrot.lane.b32.xlu1 %v2619_v13, %s2717_s24  ;;  %v1966_v13 = vld [vmem:[%s3106_s7 + $0x8] sm:$0xff] }
0x247e   :  { %v1639_v58 = vpop.permute.xlu1 %1638 }
0x247f   :  { %v1641_v59 = vmul.f32 %v2617_v49, %v1639_v58  ;;  %v1967_v58 = vld [vmem:[%s3106_s7 + $0x10] sm:$0xff] }
0x2481   :  { %1643 = vrot.lane.b32.xlu0 %v1641_v59, %s2718_s3 }
0x24f3   :  { %v1644_v60 = vpop.permute.xlu0 %1643 }
0x24f4   :  { %2387 = vmatmul.mubr.msk.f32.vlgmr.msra.gmra.mrb[14].mxu1 %vm159_vm3, %v1644_v60  ;;  %v1968_v60 = vld [vmem:[%s3106_s7 + $0x18] sm:$0xff] }
0x24f5   :  { %2522 = vmatpush3.bf16.msra.mxu1 %v2959_v4  ;;  %2408 = vmatprep.mubr.msk.f32.mxu1 %vm2715_vm0, %v2716_v1 }
0x24f6   :  { %2523 = vmatprep.subr.bf16.mxu1 %v2714_v0 }
0x24f9   :  { %2525 = vmatpush3.bf16.msra.mxu1 %v2962_v8  ;;  %v1730_v8 = vrot.slane %v1635_v57, 6 }
0x25c7   :  { %v1713_v61 = vpop.f32.mrb[14].mxu1 }
0x25c8   :  { %v1718_v62 = vrot.slane %v1713_v61, 6  ;;  %v2388_v63 = vpop.f32.mrb[15].mxu1  ;;  %v2530_v61 = vpack.c.bf16 %v1968_v60, %v1967_v58 }
0x25ca   :  { %v1720_v2 = vadd.f32 %v1718_v62, %v2988_v20 }
0x25cc   :  { %v2115_v39 = vmul.f32 -1.442695, %v1720_v2 }
0x25ce   :  { %2620 = vpow2.f32 %v2115_v39 }
0x25d8   :  { %v2621_v3 = vpop.eup %2620 }
0x25d9   :  { %v1724_v5 = vadd.f32 1.0, %v2621_v3 }
0x25db   :  { %2622 = vrcp.f32 %v1724_v5  ;;  %v2123_v5 = vld [vmem:[%s3107_s8] ss:$0 sm:$0xff] }
0x25e5   :  { %v2623_v6 = vpop.eup %2622 }
0x25e6   :  { %v1727_v7 = vmul.f32 2.0, %v2623_v6  ;;  %v1732_v11 = vmul.f32 %v2623_v6, %v1730_v8 }
0x25e8   :  { %v2116_v4 = vadd.f32 -1.0, %v1727_v7 }
0x25ea   :  { %1734 = vrot.lane.b32.xlu1 %v2116_v4, %s2717_s24 }
0x265c   :  { %v1735_v9 = vpop.permute.xlu1 %1734 }
0x265d   :  { %v1737_v10 = vmul.f32 %v2623_v6, %v1735_v9 }
0x265f   :  { %1739 = vrot.lane.b32.xlu0 %v1737_v10, %s2718_s3 }
0x26d1   :  { %v1740_v12 = vpop.permute.xlu0 %1739 }
0x26d2   :  { %v1742_v14 = vadd.f32 %v1740_v12, %v1732_v11 }
0x26d4   :  { %2624 = vtanh.f32 %v1742_v14 }
0x26de   :  { %v2625_v16 = vpop.eup %2624 }
0x26df   :  { %1745 = vrot.lane.b32.xlu1 %v2625_v16, %s2717_s24 }
0x2751   :  { %v1746_v17 = vpop.permute.xlu1 %1745 }
0x2752   :  { %v1748_v18 = vmul.f32 %v2623_v6, %v1746_v17 }
0x2754   :  { %v1750_v19 = vrot.slane %v1748_v18, 2 }
0x2756   :  { %1751 = vrot.lane.b32.xlu0 %v1750_v19, %s2718_s3 }
0x27c8   :  { %v1752_v21 = vpop.permute.xlu0 %1751 }
0x27c9   :  { %2398 = vmatmul.mubr.msk.f32.vlgmr.msra.gmra.mrb[16].mxu0 %vm159_vm3, %v1752_v21 }
0x27ca   :  { %2419 = vmatprep.mubr.msk.f32.mxu0 %vm2715_vm0, %v2716_v1  ;;  %v1838_v1 = vrot.slane %v1742_v14, 6 }
0x289c   :  { %v1821_v23 = vpop.f32.mrb[16].mxu0 }
0x289d   :  { %v1826_v24 = vrot.slane %v1821_v23, 4  ;;  %v2399_v25 = vpop.f32.mrb[17].mxu0 }
0x289f   :  { %v1828_v26 = vadd.f32 %v1826_v24, %v2988_v20 }
0x28a1   :  { %v2118_v27 = vmul.f32 -1.442695, %v1828_v26 }
0x28a3   :  { %2626 = vpow2.f32 %v2118_v27 }
0x28ad   :  { %v2627_v28 = vpop.eup %2626 }
0x28ae   :  { %v1832_v29 = vadd.f32 1.0, %v2627_v28 }
0x28b0   :  { %2628 = vrcp.f32 %v1832_v29 }
0x28ba   :  { %v2629_v30 = vpop.eup %2628 }
0x28bb   :  { %v1835_v31 = vmul.f32 2.0, %v2629_v30  ;;  %v1840_v35 = vmul.f32 %v2629_v30, %v1838_v1 }
0x28bd   :  { %v2119_v32 = vadd.f32 -1.0, %v1835_v31 }
0x28bf   :  { %1842 = vrot.lane.b32.xlu1 %v2119_v32, %s2717_s24 }
0x2931   :  { %v1843_v33 = vpop.permute.xlu1 %1842 }
0x2932   :  { %v1845_v34 = vmul.f32 %v2629_v30, %v1843_v33 }
0x2934   :  { %1847 = vrot.lane.b32.xlu0 %v1845_v34, %s2718_s3 }
0x29a6   :  { %v1848_v15 = vpop.permute.xlu0 %1847 }
0x29a7   :  { %v1850_v36 = vadd.f32 %v1848_v15, %v1840_v35 }
0x29a9   :  { %2630 = vtanh.f32 %v1850_v36  ;;  %v1946_v54 = vrot.slane %v1850_v36, 6 }
0x29b3   :  { %v2631_v37 = vpop.eup %2630 }
0x29b4   :  { %1853 = vrot.lane.b32.xlu1 %v2631_v37, %s2717_s24 }
0x2a26   :  { %v1854_v22 = vpop.permute.xlu1 %1853 }
0x2a27   :  { %v1856_v38 = vmul.f32 %v2629_v30, %v1854_v22 }
0x2a29   :  { %v1858_v40 = vrot.slane %v1856_v38, 4 }
0x2a2b   :  { %1859 = vrot.lane.b32.xlu0 %v1858_v40, %s2718_s3 }
0x2a9d   :  { %v1860_v41 = vpop.permute.xlu0 %1859 }
0x2a9e   :  { %2409 = vmatmul.mubr.msk.f32.vlgmr.msra.gmra.mrb[16].mxu1 %vm159_vm3, %v1860_v41 }
0x2b71   :  { %v1929_v42 = vpop.f32.mrb[16].mxu1 }
0x2b72   :  { %v1934_v43 = vrot.slane %v1929_v42, 2  ;;  %v2410_v44 = vpop.f32.mrb[17].mxu1 }
0x2b74   :  { %v1936_v45 = vadd.f32 %v1934_v43, %v2988_v20  ;;  %v1965_v20 = vld [vmem:[%s3106_s7] sm:$0xff]  ;;  %s2719_s7 = smov [#allocation7]  }
0x2b75   :  { %v2527_v59 = vpack.c.bf16 %v1966_v13, %v1965_v20  ;;  %s2060_s20 = sshll.u32 %s2719_s7, 4  ;;  %s2061_s20 = int_to_ptr.vmem [resolvable:$true] %s2060_s20 }
0x2b76   :  { %v2121_v46 = vmul.f32 -1.442695, %v1936_v45  ;;  %s2682_s21 = scalar_lea.vmem %s2061_s20, 32  ;;  %p2687_p3 = scmp.lt.s32.totalorder %s2061_s20, %s2061_s20 }
0x2b77   :  { %2528 = vmatpush3.bf16.msra.mxu0 %v2527_v59  ;;  %p2683_p2 = scmp.ne.s32.totalorder %s2061_s20, %s2682_s21  ;;  %p2688_p4 = scmp.lt.s32.totalorder %s2682_s21, %s2682_s21 }
0x2b78   :  { %2632 = vpow2.f32 %v2121_v46  ;;  %2529 = vmatprep.subr.bf16.mxu0 %v2714_v0 }
0x2b79   :  { %p2689_p5 = por %p2688_p4, %p2687_p3 }
0x2b7b   :  { %2531 = vmatpush3.bf16.msra.mxu0 %v2530_v61  ;;  %p2690_p6 = pnand %p2689_p5, %p2683_p2 }
0x2b82   :  { %v2633_v47 = vpop.eup %2632 }
0x2b83   :  { %v1940_v48 = vadd.f32 1.0, %v2633_v47 }
0x2b85   :  { %2634 = vrcp.f32 %v1940_v48 }
0x2b8f   :  { %v2635_v49 = vpop.eup %2634 }
0x2b90   :  { %v1943_v50 = vmul.f32 2.0, %v2635_v49  ;;  %v1948_v55 = vmul.f32 %v2635_v49, %v1946_v54 }
0x2b92   :  { %v2122_v51 = vadd.f32 -1.0, %v1943_v50 }
0x2b94   :  { %1950 = vrot.lane.b32.xlu1 %v2122_v51, %s2717_s24 }
0x2c06   :  { %v1951_v52 = vpop.permute.xlu1 %1950 }
0x2c07   :  { %v1953_v53 = vmul.f32 %v2635_v49, %v1951_v52 }
0x2c09   :  { %1955 = vrot.lane.b32.xlu0 %v1953_v53, %s2718_s3 }
0x2c7b   :  { %v1956_v56 = vpop.permute.xlu0 %1955 }
0x2c7c   :  { %v1958_v57 = vadd.f32 %v1956_v56, %v1948_v55 }
0x2c7e   :  { %2636 = vtanh.f32 %v1958_v57 }
0x2c88   :  { %v2637_v62 = vpop.eup %2636 }
0x2c89   :  { %1961 = vrot.lane.b32.xlu1 %v2637_v62, %s2717_s24 }
0x2cfb   :  { %v1962_v63 = vpop.permute.xlu1 %1961 }
0x2cfc   :  { %v1964_v2 = vmul.f32 %v2635_v49, %v1962_v63 }
0x2cfe   :  { %v1977_v39 = vrot.slane %v1964_v2, 6 }
0x2d00   :  { %1978 = vrot.lane.b32.xlu0 %v1977_v39, %s2718_s3 }
0x2d72   :  { %v1979_v3 = vpop.permute.xlu0 %1978 }
0x2d73   :  { %2420 = vmatmul.mubr.msk.f32.vlgmr.msra.gmra.mrb[18].mxu0 %vm159_vm3, %v1979_v3 }
0x2e46   :  { %v2048_v6 = vpop.f32.mrb[18].mxu0 }
0x2e47   :  { %v2049_v0 = vadd.f32 %v2123_v5, %v2048_v6  ;;  %v2421_v7 = vpop.f32.mrb[19].mxu0 }
0x2e49   :  { %2053 = vst.msk [vmem:[#allocation7] sm:$0x3] %vm2052_vm6, %v2049_v0 }
0x2e4a   :  { %2693 = shalt.err (!%p2690_p6)
}
0x2e4b   :  { %s2694_s0 = scalar_lea.hbm %s3108_s9, 32 }
0x2e4c   :  { %p2695_p7 = scmp.ne.s32.totalorder %s3108_s9, %s2694_s0  ;;  %p2698_p8 = scmp.lt.u32.totalorder %s2694_s0, %s3108_s9 }
0x2e4e   :  { %p2700_p9 = pnand %p2698_p8, %p2695_p7 }
0x2e50   :  { %2703 = shalt.err (!%p2700_p9)
}
0x2e51   :  { %2063 = dma.vmem_to_hbm [thread:$0]  %s2061_s20, 32, %s3108_s9, [#allocation4]  }
0x2e52   :  { %2708 = dma.done.wait [#allocation4], 32  }
0x2e53   :  { %2709 = vsyncadd [#allocation4], 4294967264 }
0x2e54   :  { %2067 = vsyncpa [#allocation3], 1 }
0x2e55   :  { %2068 = vsyncpa [#allocation6], 1 }
0x2e56   :  { %2069 = vsyncpa [#allocation4], 1 }

</bundles_post_ra>
